<compile_context>
chip_gen: v6e
topology: v6e:2x2x1
jax: 0.10.0
libtpu: 0.0.40
codegen_flags: <defaults>
</compile_context>

<pallas_src>
import functools

import jax
import jax.numpy as jnp
from jax.experimental import pallas as pl
from jax.experimental.pallas import tpu as pltpu

D_IN = 784
H1, H2, H3 = 512, 256, 64
NUM_CLASSES = 10
H3_PAD = 128          # layer-3 width padded to a full lane group
OUT_PAD = 128         # logits width padded to a full lane group
B_TOTAL = H1 + H2 + H3_PAD + OUT_PAD   # 1024: concatenated-bias width
NEG_BIG = -1e30       # Python literal (NOT a jnp array -> no captured const)


def _round_up(x, m):
    return (x + m - 1) // m * m


def mlp_ce_kernel(x_ref, y_ref, w1_ref, w2_ref, w3_ref, w4_ref, b_ref,
                  logits_ref, loss_ref):
    # In-kernel f32->bf16 cast of the input tile (hidden under the MXU).
    x = x_ref[...].astype(jnp.bfloat16)                  # (TB, 784) bf16

    b1 = b_ref[:, 0:H1]                                  # (1, 512) f32
    b2 = b_ref[:, H1:H1 + H2]                            # (1, 256) f32
    b3 = b_ref[:, H1 + H2:H1 + H2 + H3_PAD]              # (1, 128) f32
    b4 = b_ref[:, H1 + H2 + H3_PAD:B_TOTAL]              # (1, 128) f32

    # --- MLP hot path: bf16 MXU matmuls, f32 accumulation, f32 bias/ReLU ---
    h = jnp.dot(x, w1_ref[...], preferred_element_type=jnp.float32)
    h = jnp.maximum(h + b1, 0.0)
    h = jnp.dot(h.astype(jnp.bfloat16), w2_ref[...],
                preferred_element_type=jnp.float32)
    h = jnp.maximum(h + b2, 0.0)
    h = jnp.dot(h.astype(jnp.bfloat16), w3_ref[...],
                preferred_element_type=jnp.float32)
    h = jnp.maximum(h + b3, 0.0)
    logits = jnp.dot(h.astype(jnp.bfloat16), w4_ref[...],
                     preferred_element_type=jnp.float32) + b4   # (TB, 128) f32
    # Lane-dense bf16 writeback (CE below still uses the f32 logits).
    logits_ref[...] = logits.astype(jnp.bfloat16)

    # --- cross-entropy: mask padded classes, numerically stable log-softmax ---
    # Safe only because w4p/b4 padding columns are exactly zero and masked to
    # NEG_BIG before log-sum-exp (see pack_params).
    classes = jax.lax.broadcasted_iota(jnp.int32, logits.shape, 1)   # (TB, 128)
    masked = jnp.where(classes < NUM_CLASSES, logits, NEG_BIG)
    m = jnp.max(masked, axis=-1, keepdims=True)
    lse = m + jnp.log(jnp.sum(jnp.exp(masked - m), axis=-1, keepdims=True))

    y = y_ref[...]                                       # (TB, 1), -1 = batch pad
    onehot = (classes == y).astype(jnp.float32)
    tgt = jnp.sum(onehot * masked, axis=-1, keepdims=True)
    valid = (y >= 0).astype(jnp.float32)
    partial = jnp.sum(valid * (lse - tgt))               # per-tile loss sum

    # Store the per-tile partial sum into element [0,0] of a lane-dense
    # (8,128) tile (zeros elsewhere) -> unmasked vector store, parallel-safe.
    row_i = jax.lax.broadcasted_iota(jnp.int32, (8, 128), 0)
    col_i = jax.lax.broadcasted_iota(jnp.int32, (8, 128), 1)
    loss_ref[...] = jnp.where((row_i == 0) & (col_i == 0), partial, 0.0)


def _choose_tile(B, tile_b):
    # >=2 grid steps when the batch is big enough (v7x megacore sharding),
    # tile sized to the batch to limit padding waste, multiple of 16.
    n_tiles = max(-(-B // tile_b), 2 if B >= 32 else 1)
    tb = -(-B // n_tiles)
    return min(tile_b, _round_up(tb, 16))


def mlp_with_loss(x, y, packed, *, tile_b=1024):
    """x: (B, 1, 28, 28) float32 NCHW, y: (B,) int labels.
    Returns (logits (B, 10) f32, loss scalar ())."""
    w1, w2, w3p, w4p, b_all = packed

    B = x.shape[0]
    x_flat = x.reshape(B, -1)                             # flatten, stays f32

    TB = _choose_tile(B, tile_b)
    B_pad = _round_up(B, TB)
    num_tiles = B_pad // TB

    if B_pad != B:
        x_flat = jnp.pad(x_flat, ((0, B_pad - B), (0, 0)))
    y_pad = jnp.pad(y.astype(jnp.int32), (0, B_pad - B), constant_values=-1)
    y2d = y_pad.reshape(B_pad, 1)

    row = lambda i: (i, 0)      # batch-tiled arrays
    const = lambda i: (0, 0)    # weights/biases: resident across grid steps

    flops = 2 * B_pad * (D_IN * H1 + H1 * H2 + H2 * H3_PAD + H3_PAD * OUT_PAD)
    bytes_accessed = (
        B_pad * D_IN * 4 + B_pad * 4                                   # x, y
        + (D_IN * H1 + H1 * H2 + H2 * H3_PAD + H3_PAD * OUT_PAD) * 2   # weights
        + B_TOTAL * 4                                                  # biases
        + B_pad * OUT_PAD * 2 + num_tiles * 8 * 128 * 4)               # outputs

    logits_pad, loss_tiles = pl.pallas_call(
        mlp_ce_kernel,
        out_shape=(
            jax.ShapeDtypeStruct((B_pad, OUT_PAD), jnp.bfloat16),      # logits
            jax.ShapeDtypeStruct((num_tiles * 8, 128), jnp.float32),   # loss sums
        ),
        grid=(num_tiles,),
        in_specs=[
            pl.BlockSpec((TB, D_IN), row),            # x f32 (cast in-kernel)
            pl.BlockSpec((TB, 1), row),               # y
            pl.BlockSpec((D_IN, H1), const),          # w1 bf16
            pl.BlockSpec((H1, H2), const),            # w2 bf16
            pl.BlockSpec((H2, H3_PAD), const),        # w3 (padded) bf16
            pl.BlockSpec((H3_PAD, OUT_PAD), const),   # w4 (padded) bf16
            pl.BlockSpec((1, B_TOTAL), const),        # concatenated biases f32
        ],
        out_specs=(
            pl.BlockSpec((TB, OUT_PAD), row),
            pl.BlockSpec((8, 128), row),
        ),
        compiler_params=pltpu.CompilerParams(
            dimension_semantics=("parallel",)),
        cost_estimate=pl.CostEstimate(
            flops=flops,
            transcendentals=B_pad * OUT_PAD,
            bytes_accessed=bytes_accessed),
    )(x_flat, y2d, w1, w2, w3p, w4p, b_all)

    logits = logits_pad[:B, :NUM_CLASSES].astype(jnp.float32)
    loss = jnp.sum(loss_tiles) / jnp.float32(B)           # padded rows contribute 0
    return logits, loss


def xavier_uniform(key, fan_in, fan_out):
    limit = jnp.sqrt(6.0 / (fan_in + fan_out))
    # Stored as (in, out) so the kernel computes x @ W directly.
    return jax.random.uniform(key, (fan_in, fan_out), jnp.float32, -limit, limit)


def init_params(key):
    dims = [(D_IN, H1), (H1, H2), (H2, H3), (H3, NUM_CLASSES)]
    keys = jax.random.split(key, len(dims))
    return [(xavier_uniform(k, fi, fo), jnp.zeros((fo,), jnp.float32))
            for k, (fi, fo) in zip(keys, dims)]


def pack_params(params):
    """bf16-cast weights, zero-pad the 64/10-wide tail layers to 128 lanes,
    concatenate all biases into one (1, 1024) f32 array.
    NOTE: the padded columns of w4p/b4 MUST stay exactly zero; the in-kernel
    class mask relies on it for correct cross-entropy."""
    (w1, b1), (w2, b2), (w3, b3), (w4, b4) = params
    w3p = jnp.zeros((H2, H3_PAD), jnp.float32).at[:, :H3].set(w3)
    w4p = jnp.zeros((H3_PAD, OUT_PAD), jnp.float32).at[:H3, :NUM_CLASSES].set(w4)
    b_all = jnp.concatenate([
        b1,
        b2,
        jnp.pad(b3, (0, H3_PAD - H3)),
        jnp.pad(b4, (0, OUT_PAD - NUM_CLASSES)),
    ]).reshape(1, B_TOTAL)
    return (w1.astype(jnp.bfloat16),
            w2.astype(jnp.bfloat16),
            w3p.astype(jnp.bfloat16),
            w4p.astype(jnp.bfloat16),
            b_all.astype(jnp.float32))


if __name__ == "__main__":
    key = jax.random.PRNGKey(0)
    k_params, k_x, k_y = jax.random.split(key, 3)

    params = init_params(k_params)
    packed = pack_params(params)

    B = 8
    x = jax.random.normal(k_x, (B, 1, 28, 28), jnp.float32)   # NCHW, 1*28*28 = 784
    y = jax.random.randint(k_y, (B,), 0, NUM_CLASSES, jnp.int32)

    run = jax.jit(functools.partial(mlp_with_loss, packed=packed))
    logits, loss = run(x, y)
    jax.block_until_ready((logits, loss))

    assert logits.shape == (B, NUM_CLASSES)
    assert loss.shape == ()
    assert bool(jnp.isfinite(loss))
    print("KERNEL_OK")
</pallas_src>

<mosaic_0001>
module attributes {stable_mosaic.version = 11 : i64} {
  func.func @mlp_ce_kernel(%arg0: i32, %arg1: memref<16x784xf32, #tpu.memory_space<vmem>>, %arg2: memref<16x1xi32, #tpu.memory_space<vmem>>, %arg3: memref<784x512xbf16, #tpu.memory_space<vmem>>, %arg4: memref<512x256xbf16, #tpu.memory_space<vmem>>, %arg5: memref<256x128xbf16, #tpu.memory_space<vmem>>, %arg6: memref<128x128xbf16, #tpu.memory_space<vmem>>, %arg7: memref<1x1024xf32, #tpu.memory_space<vmem>>, %arg8: memref<16x128xbf16, #tpu.memory_space<vmem>>, %arg9: memref<8x128xf32, #tpu.memory_space<vmem>>) attributes {dimension_semantics = [#tpu.dimension_semantics<parallel>], iteration_bounds = array<i64: 1>, scalar_prefetch = 0 : i64, scratch_operands = 0 : i64, tpu.core_type = #tpu.core_type<tc>, window_params = [{transform_indices = @transform_0, window_bounds = array<i64: 16, 784>}, {transform_indices = @transform_1, window_bounds = array<i64: 16, 1>}, {pipeline_mode = #tpu.pipeline_mode<synchronous>, transform_indices = @transform_2, window_bounds = array<i64: 784, 512>}, {pipeline_mode = #tpu.pipeline_mode<synchronous>, transform_indices = @transform_3, window_bounds = array<i64: 512, 256>}, {pipeline_mode = #tpu.pipeline_mode<synchronous>, transform_indices = @transform_4, window_bounds = array<i64: 256, 128>}, {pipeline_mode = #tpu.pipeline_mode<synchronous>, transform_indices = @transform_5, window_bounds = array<i64: 128, 128>}, {pipeline_mode = #tpu.pipeline_mode<synchronous>, transform_indices = @transform_6, window_bounds = array<i64: 1, 1024>}, {transform_indices = @transform_7, window_bounds = array<i64: 16, 128>}, {transform_indices = @transform_8, window_bounds = array<i64: 8, 128>}]} {
    %c0 = arith.constant 0 : index
    %c0_0 = arith.constant 0 : index
    %0 = vector.load %arg1[%c0, %c0_0] : memref<16x784xf32, #tpu.memory_space<vmem>>, vector<16x784xf32>
    %1 = arith.truncf %0 : vector<16x784xf32> to vector<16x784xbf16>
    %c0_1 = arith.constant 0 : index
    %c0_2 = arith.constant 0 : index
    %2 = vector.load %arg7[%c0_1, %c0_2] : memref<1x1024xf32, #tpu.memory_space<vmem>>, vector<1x512xf32>
    %c0_3 = arith.constant 0 : index
    %c512 = arith.constant 512 : index
    %3 = vector.load %arg7[%c0_3, %c512] : memref<1x1024xf32, #tpu.memory_space<vmem>>, vector<1x256xf32>
    %c0_4 = arith.constant 0 : index
    %c768 = arith.constant 768 : index
    %4 = vector.load %arg7[%c0_4, %c768] : memref<1x1024xf32, #tpu.memory_space<vmem>>, vector<1x128xf32>
    %c0_5 = arith.constant 0 : index
    %c896 = arith.constant 896 : index
    %5 = vector.load %arg7[%c0_5, %c896] : memref<1x1024xf32, #tpu.memory_space<vmem>>, vector<1x128xf32>
    %c0_6 = arith.constant 0 : index
    %c0_7 = arith.constant 0 : index
    %6 = vector.load %arg3[%c0_6, %c0_7] : memref<784x512xbf16, #tpu.memory_space<vmem>>, vector<784x512xbf16>
    %cst = arith.constant dense<0.000000e+00> : vector<16x512xf32>
    %7 = tpu.matmul %1, %6, %cst {dimension_numbers = #tpu.dot_dimension_numbers<[1], [0], [0], [1], [0, 0, 1, 1], [], []>} : vector<16x784xbf16>, vector<784x512xbf16>, vector<16x512xf32> -> vector<16x512xf32>
    %8 = vector.broadcast %2 : vector<1x512xf32> to vector<16x512xf32>
    %9 = arith.addf %7, %8 : vector<16x512xf32>
    %cst_8 = arith.constant 0.000000e+00 : f32
    %10 = vector.broadcast %cst_8 : f32 to vector<16x512xf32>
    %11 = arith.maximumf %9, %10 : vector<16x512xf32>
    %12 = arith.truncf %11 : vector<16x512xf32> to vector<16x512xbf16>
    %c0_9 = arith.constant 0 : index
    %c0_10 = arith.constant 0 : index
    %13 = vector.load %arg4[%c0_9, %c0_10] : memref<512x256xbf16, #tpu.memory_space<vmem>>, vector<512x256xbf16>
    %cst_11 = arith.constant dense<0.000000e+00> : vector<16x256xf32>
    %14 = tpu.matmul %12, %13, %cst_11 {dimension_numbers = #tpu.dot_dimension_numbers<[1], [0], [0], [1], [0, 0, 1, 1], [], []>} : vector<16x512xbf16>, vector<512x256xbf16>, vector<16x256xf32> -> vector<16x256xf32>
    %15 = vector.broadcast %3 : vector<1x256xf32> to vector<16x256xf32>
    %16 = arith.addf %14, %15 : vector<16x256xf32>
    %cst_12 = arith.constant 0.000000e+00 : f32
    %17 = vector.broadcast %cst_12 : f32 to vector<16x256xf32>
    %18 = arith.maximumf %16, %17 : vector<16x256xf32>
    %19 = arith.truncf %18 : vector<16x256xf32> to vector<16x256xbf16>
    %c0_13 = arith.constant 0 : index
    %c0_14 = arith.constant 0 : index
    %20 = vector.load %arg5[%c0_13, %c0_14] : memref<256x128xbf16, #tpu.memory_space<vmem>>, vector<256x128xbf16>
    %cst_15 = arith.constant dense<0.000000e+00> : vector<16x128xf32>
    %21 = tpu.matmul %19, %20, %cst_15 {dimension_numbers = #tpu.dot_dimension_numbers<[1], [0], [0], [1], [0, 0, 1, 1], [], []>} : vector<16x256xbf16>, vector<256x128xbf16>, vector<16x128xf32> -> vector<16x128xf32>
    %22 = vector.broadcast %4 : vector<1x128xf32> to vector<16x128xf32>
    %23 = arith.addf %21, %22 : vector<16x128xf32>
    %cst_16 = arith.constant 0.000000e+00 : f32
    %24 = vector.broadcast %cst_16 : f32 to vector<16x128xf32>
    %25 = arith.maximumf %23, %24 : vector<16x128xf32>
    %26 = arith.truncf %25 : vector<16x128xf32> to vector<16x128xbf16>
    %c0_17 = arith.constant 0 : index
    %c0_18 = arith.constant 0 : index
    %27 = vector.load %arg6[%c0_17, %c0_18] : memref<128x128xbf16, #tpu.memory_space<vmem>>, vector<128x128xbf16>
    %cst_19 = arith.constant dense<0.000000e+00> : vector<16x128xf32>
    %28 = tpu.matmul %26, %27, %cst_19 {dimension_numbers = #tpu.dot_dimension_numbers<[1], [0], [0], [1], [0, 0, 1, 1], [], []>} : vector<16x128xbf16>, vector<128x128xbf16>, vector<16x128xf32> -> vector<16x128xf32>
    %29 = vector.broadcast %5 : vector<1x128xf32> to vector<16x128xf32>
    %30 = arith.addf %28, %29 : vector<16x128xf32>
    %31 = arith.truncf %30 : vector<16x128xf32> to vector<16x128xbf16>
    %c0_20 = arith.constant 0 : index
    %c0_21 = arith.constant 0 : index
    %32 = vector.load %arg8[%c0_20, %c0_21] : memref<16x128xbf16, #tpu.memory_space<vmem>>, vector<16x128xbf16>
    tpu.vector_store %arg8[%c0_20, %c0_21], %31 {strides = array<i32>} : memref<16x128xbf16, #tpu.memory_space<vmem>>, vector<16x128xbf16>,
    %33 = tpu.iota {dimensions = array<i32: 1>} : vector<16x128xi32>
    %c10_i32 = arith.constant 10 : i32
    %34 = vector.broadcast %c10_i32 : i32 to vector<16x128xi32>
    %35 = arith.cmpi slt, %33, %34 : vector<16x128xi32>
    %cst_22 = arith.constant -1.000000e+30 : f32
    %36 = vector.broadcast %cst_22 : f32 to vector<16x128xf32>
    %37 = arith.select %35, %30, %36 : vector<16x128xi1>, vector<16x128xf32>
    %cst_23 = arith.constant dense<0xFF800000> : vector<16xf32>
    %38 = vector.multi_reduction <maximumf>, %37, %cst_23 [1] : vector<16x128xf32> to vector<16xf32>
    %39 = vector.shape_cast %38 : vector<16xf32> to vector<16x1xf32>
    %40 = vector.broadcast %39 : vector<16x1xf32> to vector<16x128xf32>
    %41 = arith.subf %37, %40 : vector<16x128xf32>
    %42 = math.exp %41 : vector<16x128xf32>
    %cst_24 = arith.constant dense<0.000000e+00> : vector<16xf32>
    %43 = vector.multi_reduction <add>, %42, %cst_24 [1] : vector<16x128xf32> to vector<16xf32>
    %44 = vector.shape_cast %43 : vector<16xf32> to vector<16x1xf32>
    %45 = math.log %44 : vector<16x1xf32>
    %46 = arith.addf %39, %45 : vector<16x1xf32>
    %c0_25 = arith.constant 0 : index
    %c0_26 = arith.constant 0 : index
    %47 = vector.load %arg2[%c0_25, %c0_26] : memref<16x1xi32, #tpu.memory_space<vmem>>, vector<16x1xi32>
    %48 = vector.broadcast %47 : vector<16x1xi32> to vector<16x128xi32>
    %49 = arith.cmpi eq, %33, %48 : vector<16x128xi32>
    %50 = arith.extui %49 : vector<16x128xi1> to vector<16x128xi32>
    %51 = arith.sitofp %50 : vector<16x128xi32> to vector<16x128xf32>
    %52 = arith.mulf %51, %37 : vector<16x128xf32>
    %cst_27 = arith.constant dense<0.000000e+00> : vector<16xf32>
    %53 = vector.multi_reduction <add>, %52, %cst_27 [1] : vector<16x128xf32> to vector<16xf32>
    %54 = vector.shape_cast %53 : vector<16xf32> to vector<16x1xf32>
    %c0_i32 = arith.constant 0 : i32
    %55 = vector.broadcast %c0_i32 : i32 to vector<16x1xi32>
    %56 = arith.cmpi sge, %47, %55 : vector<16x1xi32>
    %57 = arith.extui %56 : vector<16x1xi1> to vector<16x1xi32>
    %58 = arith.sitofp %57 : vector<16x1xi32> to vector<16x1xf32>
    %59 = arith.subf %46, %54 : vector<16x1xf32>
    %60 = arith.mulf %58, %59 : vector<16x1xf32>
    %61 = vector.shape_cast %60 : vector<16x1xf32> to vector<1x16x1xf32>
    %cst_28 = arith.constant dense<0.000000e+00> : vector<1xf32>
    %62 = vector.multi_reduction <add>, %61, %cst_28 [1, 2] : vector<1x16x1xf32> to vector<1xf32>
    %63 = vector.shape_cast %62 : vector<1xf32> to vector<1x1x1xf32>
    %64 = vector.extract %63[0, 0, 0] : f32 from vector<1x1x1xf32>
    %65 = tpu.iota {dimensions = array<i32: 0>} : vector<8x128xi32>
    %66 = tpu.iota {dimensions = array<i32: 1>} : vector<8x128xi32>
    %c0_i32_29 = arith.constant 0 : i32
    %67 = vector.broadcast %c0_i32_29 : i32 to vector<8x128xi32>
    %68 = arith.cmpi eq, %65, %67 : vector<8x128xi32>
    %c0_i32_30 = arith.constant 0 : i32
    %69 = vector.broadcast %c0_i32_30 : i32 to vector<8x128xi32>
    %70 = arith.cmpi eq, %66, %69 : vector<8x128xi32>
    %71 = arith.andi %68, %70 : vector<8x128xi1>
    %cst_31 = arith.constant 0.000000e+00 : f32
    %72 = vector.broadcast %64 : f32 to vector<8x128xf32>
    %73 = vector.broadcast %cst_31 : f32 to vector<8x128xf32>
    %74 = arith.select %71, %72, %73 : vector<8x128xi1>, vector<8x128xf32>
    %c0_32 = arith.constant 0 : index
    %c0_33 = arith.constant 0 : index
    %75 = vector.load %arg9[%c0_32, %c0_33] : memref<8x128xf32, #tpu.memory_space<vmem>>, vector<8x128xf32>
    tpu.vector_store %arg9[%c0_32, %c0_33], %74 {strides = array<i32>} : memref<8x128xf32, #tpu.memory_space<vmem>>, vector<8x128xf32>,
    return
  }
  func.func @transform_0(%arg0: i32) -> (i32, i32) {
    %c0_i32 = arith.constant 0 : i32
    %c0_i32_0 = arith.constant 0 : i32
    return %arg0, %c0_i32 : i32, i32
  }
  func.func @transform_1(%arg0: i32) -> (i32, i32) {
    %c0_i32 = arith.constant 0 : i32
    %c0_i32_0 = arith.constant 0 : i32
    return %arg0, %c0_i32 : i32, i32
  }
  func.func @transform_2(%arg0: i32) -> (i32, i32) {
    %c0_i32 = arith.constant 0 : i32
    %c0_i32_0 = arith.constant 0 : i32
    %c0_i32_1 = arith.constant 0 : i32
    return %c0_i32, %c0_i32_0 : i32, i32
  }
  func.func @transform_3(%arg0: i32) -> (i32, i32) {
    %c0_i32 = arith.constant 0 : i32
    %c0_i32_0 = arith.constant 0 : i32
    %c0_i32_1 = arith.constant 0 : i32
    return %c0_i32, %c0_i32_0 : i32, i32
  }
  func.func @transform_4(%arg0: i32) -> (i32, i32) {
    %c0_i32 = arith.constant 0 : i32
    %c0_i32_0 = arith.constant 0 : i32
    %c0_i32_1 = arith.constant 0 : i32
    return %c0_i32, %c0_i32_0 : i32, i32
  }
  func.func @transform_5(%arg0: i32) -> (i32, i32) {
    %c0_i32 = arith.constant 0 : i32
    %c0_i32_0 = arith.constant 0 : i32
    %c0_i32_1 = arith.constant 0 : i32
    return %c0_i32, %c0_i32_0 : i32, i32
  }
  func.func @transform_6(%arg0: i32) -> (i32, i32) {
    %c0_i32 = arith.constant 0 : i32
    %c0_i32_0 = arith.constant 0 : i32
    %c0_i32_1 = arith.constant 0 : i32
    return %c0_i32, %c0_i32_0 : i32, i32
  }
  func.func @transform_7(%arg0: i32) -> (i32, i32) {
    %c0_i32 = arith.constant 0 : i32
    %c0_i32_0 = arith.constant 0 : i32
    return %arg0, %c0_i32 : i32, i32
  }
  func.func @transform_8(%arg0: i32) -> (i32, i32) {
    %c0_i32 = arith.constant 0 : i32
    %c0_i32_0 = arith.constant 0 : i32
    return %arg0, %c0_i32 : i32, i32
  }
}

</mosaic_0001>

<bundles_post_ra>
// kernel: mlp_with_loss.1
= control target key start
LH: loop header
LB: loop body
LE: loop exit
PB: predicated region body
PF: predicated region fallthrough
CT: control target
= control target key end

     0   :  { %14 = vsyncpa [#allocation3], 0  ;;  %s3302_s27 = smov [#allocation2]   ;;  %s3764_s0 = inlined_call_operand.vmem [shape: f32[16,784], index: 0, kind: input, shape index: {}]   ;;  %s3765_s1 = inlined_call_operand.vmem [shape: s32[16,1], index: 1, kind: input, shape index: {}]   ;;  %s3766_s2 = inlined_call_operand.hbm [shape: bf16[784,512], index: 2, kind: input, shape index: {}]   ;;  %s3767_s3 = inlined_call_operand.vmem [shape: bf16[512,256], index: 3, kind: input, shape index: {}]   ;;  %s3768_s4 = inlined_call_operand.vmem [shape: bf16[256,128], index: 4, kind: input, shape index: {}]   ;;  %s3769_s5 = inlined_call_operand.vmem [shape: bf16[128,128], index: 5, kind: input, shape index: {}]   ;;  %s3770_s6 = inlined_call_operand.vmem [shape: f32[1,1024], index: 6, kind: input, shape index: {}]   ;;  %s3771_s7 = inlined_call_operand.vmem [shape: bf16[16,128], index: 7, kind: output, shape index: {0}]   ;;  %s3772_s8 = inlined_call_operand.vmem [shape: f32[8,128], index: 8, kind: output, shape index: {1}]  }
   0x1   :  { %s24_s28 = sshll.u32 %s3302_s27, 4  ;;  %s25_s28 = int_to_ptr.vmem [resolvable:$true] %s24_s28 }
   0x2   :  { %s3288_s29 = scalar_lea.vmem %s25_s28, 25088  ;;  %p3293_p1 = scmp.lt.s32.totalorder %s25_s28, %s25_s28 }
   0x3   :  { %p3289_p0 = scmp.ne.s32.totalorder %s25_s28, %s3288_s29  ;;  %p3294_p2 = scmp.lt.s32.totalorder %s3288_s29, %s3288_s29 }
   0x5   :  { %p3295_p3 = por %p3294_p2, %p3293_p1 }
   0x7   :  { %p3296_p4 = pnand %p3295_p3, %p3289_p0 }
   0x9   :  { %3299 = shalt.err (!%p3296_p4)
}
   0xa   :  { %s3303_s30 = smov 256   ;;  %s3304_s9 = smov 16  }
   0xb   :  { %30 = dma.hbm_to_vmem [thread:$0]  %s3766_s2, 25088, %s25_s28, [#allocation3], %s3303_s30, %s3303_s30, %s3304_s9  }
   0xc   :  { %3300 = dma.done.wait [#allocation3], 25088  }
   0xd   :  { %3301 = vsyncadd [#allocation3], 4294942208  ;;  %v3305_v0 = vmov 0   ;;  %v2858_v1 = vld [vmem:[#allocation2 + $0xe4] ss:$16 sps:$4 sm:$0xff]   ;;  %v44_v47 = vld [vmem:[%s3764_s0 + $0x8] sm:$0xff] }
   0xe   :  { %2856 = vset.pattern.permute.xlu1 %v3305_v0  ;;  %2857 = vset.pattern.permute.xlu0 %v3305_v0  ;;  %v2860_v2 = vld [vmem:[#allocation2 + $0x2e4] ss:$16 sps:$4 sm:$0xff]   ;;  %v2862_v3 = vld [vmem:[#allocation2 + $0xe0] ss:$16 sps:$4 sm:$0xff]   ;;  %v46_v49 = vld [vmem:[%s3764_s0 + $0x18] sm:$0xff]  ;;  %vm1265_vm0 = vcmask 130048  }
   0xf   :  { %1269 = vmatprep.subr.bf16.mxu0 %v2858_v1  ;;  %v2863_v4 = vld [vmem:[#allocation2 + $0x2e0] ss:$16 sps:$4 sm:$0xff]   ;;  %1312 = vmatprep.subr.bf16.mxu1 %v2860_v2  ;;  %v2864_v5 = vld [vmem:[#allocation2 + $0xc4] ss:$16 sps:$4 sm:$0xff]   ;;  %vm3307_vm1 = vmmov 0   ;;  %vm2466_vm7 = vcmask 7168  }
  0x10   :  { %1270 = vmatpush1.bf16.msra.mxu0 %v2862_v3  ;;  %1313 = vmatpush1.bf16.msra.mxu1 %v2863_v4  ;;  %v2866_v6 = vld [vmem:[#allocation2 + $0x2c4] ss:$16 sps:$4 sm:$0xff]   ;;  %v2868_v7 = vld [vmem:[#allocation2 + $0xc0] ss:$16 sps:$4 sm:$0xff]  }
  0x11   :  { %1271 = vmatprep.subr.bf16.mxu0 %v2864_v5  ;;  %v2869_v8 = vld [vmem:[#allocation2 + $0x2c0] ss:$16 sps:$4 sm:$0xff]   ;;  %1314 = vmatprep.subr.bf16.mxu1 %v2866_v6  ;;  %v2870_v9 = vld [vmem:[#allocation2 + $0xa4] ss:$16 sps:$4 sm:$0xff]  }
  0x12   :  { %v2872_v10 = vld [vmem:[#allocation2 + $0x2a4] ss:$16 sps:$4 sm:$0xff]   ;;  %v2874_v11 = vld [vmem:[#allocation2 + $0xa0] ss:$16 sps:$4 sm:$0xff]  }
  0x13   :  { %v2875_v12 = vld [vmem:[#allocation2 + $0x2a0] ss:$16 sps:$4 sm:$0xff]   ;;  %v2876_v13 = vld [vmem:[#allocation2 + $0x84] ss:$16 sps:$4 sm:$0xff]  }
  0x14   :  { %1272 = vmatpush1.bf16.msra.mxu0 %v2868_v7  ;;  %1315 = vmatpush1.bf16.msra.mxu1 %v2869_v8  ;;  %v2878_v14 = vld [vmem:[#allocation2 + $0x284] ss:$16 sps:$4 sm:$0xff]   ;;  %v2880_v15 = vld [vmem:[#allocation2 + $0x80] ss:$16 sps:$4 sm:$0xff]  }
  0x15   :  { %1273 = vmatprep.subr.bf16.mxu0 %v2870_v9  ;;  %1316 = vmatprep.subr.bf16.mxu1 %v2872_v10  ;;  %v2881_v16 = vld [vmem:[#allocation2 + $0x280] ss:$16 sps:$4 sm:$0xff]   ;;  %v2882_v17 = vld [vmem:[#allocation2 + $0x64] ss:$16 sps:$4 sm:$0xff]   ;;  %v50_v9 = vld [vmem:[%s3764_s0 + $0x38] sm:$0xff] }
  0x16   :  { %v2884_v18 = vld [vmem:[#allocation2 + $0x264] ss:$16 sps:$4 sm:$0xff]   ;;  %v2886_v19 = vld [vmem:[#allocation2 + $0x60] ss:$16 sps:$4 sm:$0xff]  }
  0x17   :  { %v2887_v20 = vld [vmem:[#allocation2 + $0x260] ss:$16 sps:$4 sm:$0xff]   ;;  %v2888_v21 = vld [vmem:[#allocation2 + $0x44] ss:$16 sps:$4 sm:$0xff]  }
  0x18   :  { %1274 = vmatpush1.bf16.msra.mxu0 %v2874_v11  ;;  %1317 = vmatpush1.bf16.msra.mxu1 %v2875_v12  ;;  %v2890_v22 = vld [vmem:[#allocation2 + $0x244] ss:$16 sps:$4 sm:$0xff]   ;;  %v2892_v23 = vld [vmem:[#allocation2 + $0x40] ss:$16 sps:$4 sm:$0xff]   ;;  %v52_v11 = vld [vmem:[%s3764_s0 + $0x48] sm:$0xff] }
  0x19   :  { %1275 = vmatprep.subr.bf16.mxu0 %v2876_v13  ;;  %1318 = vmatprep.subr.bf16.mxu1 %v2878_v14  ;;  %v2893_v24 = vld [vmem:[#allocation2 + $0x240] ss:$16 sps:$4 sm:$0xff]   ;;  %v2894_v25 = vld [vmem:[#allocation2 + $0x24] ss:$16 sps:$4 sm:$0xff]  }
  0x1a   :  { %v2896_v26 = vld [vmem:[#allocation2 + $0x224] ss:$16 sps:$4 sm:$0xff]   ;;  %v2898_v27 = vld [vmem:[#allocation2 + $0x20] ss:$16 sps:$4 sm:$0xff]  }
  0x1b   :  { %v2899_v28 = vld [vmem:[#allocation2 + $0x220] ss:$16 sps:$4 sm:$0xff]   ;;  %v2900_v29 = vld [vmem:[#allocation2 + $0x4] ss:$16 sps:$4 sm:$0xff]  }
  0x1c   :  { %1276 = vmatpush1.bf16.msra.mxu0 %v2880_v15  ;;  %1319 = vmatpush1.bf16.msra.mxu1 %v2881_v16  ;;  %v2902_v30 = vld [vmem:[#allocation2 + $0x204] ss:$16 sps:$4 sm:$0xff]   ;;  %v2904_v31 = vld [vmem:[#allocation2] ss:$16 sps:$4 sm:$0xff]  }
  0x1d   :  { %1277 = vmatprep.subr.bf16.mxu0 %v2882_v17  ;;  %1320 = vmatprep.subr.bf16.mxu1 %v2884_v18  ;;  %v2905_v32 = vld [vmem:[#allocation2 + $0x200] ss:$16 sps:$4 sm:$0xff]   ;;  %v2906_v33 = vld [vmem:[#allocation2 + $0x1e4] ss:$16 sps:$4 sm:$0xff]  }
  0x1e   :  { %v2908_v34 = vld [vmem:[#allocation2 + $0x3e4] ss:$16 sps:$4 sm:$0xff]   ;;  %v2910_v35 = vld [vmem:[#allocation2 + $0x1e0] ss:$16 sps:$4 sm:$0xff]  }
  0x1f   :  { %v2911_v36 = vld [vmem:[#allocation2 + $0x3e0] ss:$16 sps:$4 sm:$0xff]   ;;  %v2912_v37 = vld [vmem:[#allocation2 + $0x1c4] ss:$16 sps:$4 sm:$0xff]  }
  0x20   :  { %1278 = vmatpush1.bf16.msra.mxu0 %v2886_v19  ;;  %1321 = vmatpush1.bf16.msra.mxu1 %v2887_v20  ;;  %v2914_v38 = vld [vmem:[#allocation2 + $0x3c4] ss:$16 sps:$4 sm:$0xff]   ;;  %v2916_v39 = vld [vmem:[#allocation2 + $0x1c0] ss:$16 sps:$4 sm:$0xff]   ;;  %v2965_v19 = vld [vmem:[#allocation2 + $0xec] ss:$16 sps:$4 sm:$0xff]  }
  0x21   :  { %1279 = vmatprep.subr.bf16.mxu0 %v2888_v21  ;;  %1322 = vmatprep.subr.bf16.mxu1 %v2890_v22  ;;  %v2917_v40 = vld [vmem:[#allocation2 + $0x3c0] ss:$16 sps:$4 sm:$0xff]   ;;  %v2918_v41 = vld [vmem:[#allocation2 + $0x1a4] ss:$16 sps:$4 sm:$0xff]   ;;  %v56_v22 = vld [vmem:[%s3764_s0 + $0x68] sm:$0xff] }
  0x22   :  { %v2920_v42 = vld [vmem:[#allocation2 + $0x3a4] ss:$16 sps:$4 sm:$0xff]   ;;  %v2922_v43 = vld [vmem:[#allocation2 + $0x1a0] ss:$16 sps:$4 sm:$0xff]  }
  0x23   :  { %v2923_v44 = vld [vmem:[#allocation2 + $0x3a0] ss:$16 sps:$4 sm:$0xff]   ;;  %v2924_v45 = vld [vmem:[#allocation2 + $0x184] ss:$16 sps:$4 sm:$0xff]  }
  0x24   :  { %1280 = vmatpush1.bf16.msra.mxu0 %v2892_v23  ;;  %1323 = vmatpush1.bf16.msra.mxu1 %v2893_v24  ;;  %v2926_v46 = vld [vmem:[#allocation2 + $0x384] ss:$16 sps:$4 sm:$0xff]   ;;  %v2928_v51 = vld [vmem:[#allocation2 + $0x180] ss:$16 sps:$4 sm:$0xff]  }
  0x25   :  { %1281 = vmatprep.subr.bf16.mxu0 %v2894_v25  ;;  %1324 = vmatprep.subr.bf16.mxu1 %v2896_v26  ;;  %v51_v48 = vld [vmem:[%s3764_s0 + $0x40] sm:$0xff]  ;;  %v53_v50 = vld [vmem:[%s3764_s0 + $0x50] sm:$0xff]  ;;  %v2963_v25 = vld [vmem:[#allocation2 + $0xe8] ss:$16 sps:$4 sm:$0xff]  }
  0x26   :  { %v2929_v52 = vld [vmem:[#allocation2 + $0x380] ss:$16 sps:$4 sm:$0xff]   ;;  %v2930_v53 = vld [vmem:[#allocation2 + $0x164] ss:$16 sps:$4 sm:$0xff]   ;;  %v3370_v54 = vpack.c.bf16 %v51_v48, %v44_v47  ;;  %v3372_v55 = vpack.c.bf16 %v53_v50, %v46_v49  ;;  %v2993_v48 = vld [vmem:[#allocation2 + $0x48] ss:$16 sps:$4 sm:$0xff]  }
  0x27   :  { %v2932_v56 = vld [vmem:[#allocation2 + $0x364] ss:$16 sps:$4 sm:$0xff]   ;;  %v2934_v57 = vld [vmem:[#allocation2 + $0x160] ss:$16 sps:$4 sm:$0xff]   ;;  %v3001_v50 = vld [vmem:[#allocation2 + $0x2c] ss:$16 sps:$4 sm:$0xff]  }
  0x28   :  { %1282 = vmatpush1.bf16.msra.mxu0 %v2898_v27  ;;  %1325 = vmatpush1.bf16.msra.mxu1 %v2899_v28  ;;  %v2935_v58 = vld [vmem:[#allocation2 + $0x360] ss:$16 sps:$4 sm:$0xff]   ;;  %v2936_v59 = vld [vmem:[#allocation2 + $0x144] ss:$16 sps:$4 sm:$0xff]   ;;  %v2971_v27 = vld [vmem:[#allocation2 + $0xcc] ss:$16 sps:$4 sm:$0xff]  }
  0x29   :  { %1283 = vmatprep.subr.bf16.mxu0 %v2900_v29  ;;  %1326 = vmatprep.subr.bf16.mxu1 %v2902_v30  ;;  %v2938_v60 = vld [vmem:[#allocation2 + $0x344] ss:$16 sps:$4 sm:$0xff]   ;;  %v2940_v61 = vld [vmem:[#allocation2 + $0x140] ss:$16 sps:$4 sm:$0xff]   ;;  %v2969_v29 = vld [vmem:[#allocation2 + $0xc8] ss:$16 sps:$4 sm:$0xff]  }
  0x2a   :  { %1301 = vmatprep.mubr.bf16.mxu0 %v3370_v54  ;;  %1344 = vmatprep.mubr.bf16.mxu1 %v3372_v55  ;;  %v2941_v62 = vld [vmem:[#allocation2 + $0x340] ss:$16 sps:$4 sm:$0xff]   ;;  %v2942_v63 = vld [vmem:[#allocation2 + $0x124] ss:$16 sps:$4 sm:$0xff]  }
  0x2b   :  { %v2944_v1 = vld [vmem:[#allocation2 + $0x324] ss:$16 sps:$4 sm:$0xff]   ;;  %v2946_v2 = vld [vmem:[#allocation2 + $0x120] ss:$16 sps:$4 sm:$0xff]  }
  0x2c   :  { %1284 = vmatpush1.bf16.msra.mxu0 %v2904_v31  ;;  %1327 = vmatpush1.bf16.msra.mxu1 %v2905_v32  ;;  %v2947_v3 = vld [vmem:[#allocation2 + $0x320] ss:$16 sps:$4 sm:$0xff]   ;;  %v2948_v4 = vld [vmem:[#allocation2 + $0x104] ss:$16 sps:$4 sm:$0xff]   ;;  %v2977_v31 = vld [vmem:[#allocation2 + $0xac] ss:$16 sps:$4 sm:$0xff]  }
  0x2d   :  { %1285 = vmatprep.subr.bf16.mxu0 %v2906_v33  ;;  %1328 = vmatprep.subr.bf16.mxu1 %v2908_v34  ;;  %v2950_v5 = vld [vmem:[#allocation2 + $0x304] ss:$16 sps:$4 sm:$0xff]   ;;  %v2952_v6 = vld [vmem:[#allocation2 + $0x100] ss:$16 sps:$4 sm:$0xff]   ;;  %v2975_v33 = vld [vmem:[#allocation2 + $0xa8] ss:$16 sps:$4 sm:$0xff]  }
  0x2e   :  { %v2953_v7 = vld [vmem:[#allocation2 + $0x300] ss:$16 sps:$4 sm:$0xff]   ;;  %v2956_v12 = vld [vmem:[#allocation2 + $0x4e4] ss:$16 sps:$4 sm:$0xff]  }
  0x2f   :  { %v43_v8 = vld [vmem:[%s3764_s0] sm:$0xff]  ;;  %v45_v10 = vld [vmem:[%s3764_s0 + $0x10] sm:$0xff] }
  0x30   :  { %1286 = vmatpush2.bf16.msra.mxu0 %v2910_v35  ;;  %1329 = vmatpush2.bf16.msra.mxu1 %v2911_v36  ;;  %v2959_v13 = vld [vmem:[#allocation2 + $0x604] ss:$16 sps:$4 sm:$0xff]   ;;  %v3388_v14 = vpack.c.bf16 %v50_v9, %v43_v8  ;;  %v3390_v15 = vpack.c.bf16 %v52_v11, %v45_v10  ;;  %v2954_v16 = vld [vmem:[#allocation2 + $0x4e0] ss:$16 sps:$4 sm:$0xff]   ;;  %v2983_v35 = vld [vmem:[#allocation2 + $0x8c] ss:$16 sps:$4 sm:$0xff]  }
  0x31   :  { %1287 = vmatprep.subr.bf16.mxu0 %v2912_v37  ;;  %1330 = vmatprep.subr.bf16.mxu1 %v2914_v38  ;;  %v2957_v17 = vld [vmem:[#allocation2 + $0x600] ss:$16 sps:$4 sm:$0xff]   ;;  %v2962_v18 = vld [vmem:[#allocation2 + $0x4c4] ss:$16 sps:$4 sm:$0xff]   ;;  %v2981_v37 = vld [vmem:[#allocation2 + $0x88] ss:$16 sps:$4 sm:$0xff]  }
  0x32   :  { %v2960_v20 = vld [vmem:[#allocation2 + $0x4c0] ss:$16 sps:$4 sm:$0xff]   ;;  %v2968_v23 = vld [vmem:[#allocation2 + $0x4a4] ss:$16 sps:$4 sm:$0xff]   ;;  %v3031_v8 = vld [vmem:[#allocation2 + $0x18c] ss:$16 sps:$4 sm:$0xff]  }
  0x33   :  { %v49_v21 = vld [vmem:[%s3764_s0 + $0x30] sm:$0xff]  ;;  %v3029_v10 = vld [vmem:[#allocation2 + $0x188] ss:$16 sps:$4 sm:$0xff]  }
  0x34   :  { %1288 = vmatpush2.bf16.msra.mxu0 %v2916_v39  ;;  %1331 = vmatpush2.bf16.msra.mxu1 %v2917_v40  ;;  %v3401_v24 = vpack.c.bf16 %v56_v22, %v49_v21  ;;  %v2966_v26 = vld [vmem:[#allocation2 + $0x4a0] ss:$16 sps:$4 sm:$0xff]   ;;  %v2974_v28 = vld [vmem:[#allocation2 + $0x484] ss:$16 sps:$4 sm:$0xff]   ;;  %v2989_v39 = vld [vmem:[#allocation2 + $0x6c] ss:$16 sps:$4 sm:$0xff]  }
  0x35   :  { %1289 = vmatprep.subr.bf16.mxu0 %v2918_v41  ;;  %1332 = vmatprep.subr.bf16.mxu1 %v2920_v42  ;;  %v2972_v30 = vld [vmem:[#allocation2 + $0x480] ss:$16 sps:$4 sm:$0xff]   ;;  %v2980_v32 = vld [vmem:[#allocation2 + $0x464] ss:$16 sps:$4 sm:$0xff]   ;;  %v2987_v41 = vld [vmem:[#allocation2 + $0x68] ss:$16 sps:$4 sm:$0xff]  }
  0x36   :  { %v2978_v34 = vld [vmem:[#allocation2 + $0x460] ss:$16 sps:$4 sm:$0xff]   ;;  %v2986_v36 = vld [vmem:[#allocation2 + $0x444] ss:$16 sps:$4 sm:$0xff]   ;;  %v48_v42 = vld [vmem:[%s3764_s0 + $0x28] sm:$0xff] }
  0x37   :  { %v2984_v38 = vld [vmem:[#allocation2 + $0x440] ss:$16 sps:$4 sm:$0xff]   ;;  %v2992_v40 = vld [vmem:[#allocation2 + $0x424] ss:$16 sps:$4 sm:$0xff]  }
  0x38   :  { %1290 = vmatpush2.bf16.msra.mxu0 %v2922_v43  ;;  %1333 = vmatpush2.bf16.msra.mxu1 %v2923_v44  ;;  %v55_v43 = vld [vmem:[%s3764_s0 + $0x60] sm:$0xff] }
  0x39   :  { %1291 = vmatprep.subr.bf16.mxu0 %v2924_v45  ;;  %1334 = vmatprep.subr.bf16.mxu1 %v2926_v46  ;;  %v2990_v44 = vld [vmem:[#allocation2 + $0x420] ss:$16 sps:$4 sm:$0xff]   ;;  %v3412_v45 = vpack.c.bf16 %v55_v43, %v48_v42  ;;  %v2995_v46 = vld [vmem:[#allocation2 + $0x4c] ss:$16 sps:$4 sm:$0xff]   ;;  %v2998_v47 = vld [vmem:[#allocation2 + $0x404] ss:$16 sps:$4 sm:$0xff]  }
  0x3a   :  { %v2996_v49 = vld [vmem:[#allocation2 + $0x400] ss:$16 sps:$4 sm:$0xff]   ;;  %v3034_v9 = vld [vmem:[#allocation2 + $0x544] ss:$16 sps:$4 sm:$0xff]   ;;  %v3073_v42 = vld [vmem:[#allocation2 + $0x4ac] ss:$16 sps:$4 sm:$0xff]  }
  0x3b   :  { %v3032_v11 = vld [vmem:[#allocation2 + $0x540] ss:$16 sps:$4 sm:$0xff]   ;;  %v3076_v43 = vld [vmem:[#allocation2 + $0x26c] ss:$16 sps:$4 sm:$0xff]  }
  0x3c   :  { %1292 = vmatpush2.bf16.msra.mxu0 %v2928_v51  ;;  %1335 = vmatpush2.bf16.msra.mxu1 %v2929_v52  ;;  %v3004_v51 = vld [vmem:[#allocation2 + $0x5e4] ss:$16 sps:$4 sm:$0xff]   ;;  %v2999_v52 = vld [vmem:[#allocation2 + $0x28] ss:$16 sps:$4 sm:$0xff]   ;;  %v3044_v21 = vld [vmem:[#allocation2 + $0x500] ss:$16 sps:$4 sm:$0xff]  }
  0x3d   :  { %1293 = vmatprep.subr.bf16.mxu0 %v2930_v53  ;;  %1336 = vmatprep.subr.bf16.mxu1 %v2932_v56  ;;  %v3002_v53 = vld [vmem:[#allocation2 + $0x5e0] ss:$16 sps:$4 sm:$0xff]   ;;  %v3010_v56 = vld [vmem:[#allocation2 + $0x5c4] ss:$16 sps:$4 sm:$0xff]  }
  0x3e   :  { %v47_v22 = vld [vmem:[%s3764_s0 + $0x20] sm:$0xff] }
  0x40   :  { %1294 = vmatpush2.bf16.msra.mxu0 %v2934_v57  ;;  %1337 = vmatpush2.bf16.msra.mxu1 %v2935_v58  ;;  %v3005_v57 = vld [vmem:[#allocation2 + $0x8] ss:$16 sps:$4 sm:$0xff]   ;;  %v3008_v58 = vld [vmem:[#allocation2 + $0x5c0] ss:$16 sps:$4 sm:$0xff]  }
  0x41   :  { %1295 = vmatprep.subr.bf16.mxu0 %v2936_v59  ;;  %1338 = vmatprep.subr.bf16.mxu1 %v2938_v60  ;;  %v3013_v59 = vld [vmem:[#allocation2 + $0x1ec] ss:$16 sps:$4 sm:$0xff]   ;;  %v3016_v60 = vld [vmem:[#allocation2 + $0x5a4] ss:$16 sps:$4 sm:$0xff]  }
  0x44   :  { %1296 = vmatpush2.bf16.msra.mxu0 %v2940_v61  ;;  %1339 = vmatpush2.bf16.msra.mxu1 %v2941_v62  ;;  %v3011_v61 = vld [vmem:[#allocation2 + $0x1e8] ss:$16 sps:$4 sm:$0xff]   ;;  %v3014_v62 = vld [vmem:[#allocation2 + $0x5a0] ss:$16 sps:$4 sm:$0xff]  }
  0x45   :  { %1297 = vmatprep.subr.bf16.mxu0 %v2942_v63  ;;  %1340 = vmatprep.subr.bf16.mxu1 %v2944_v1  ;;  %v3019_v63 = vld [vmem:[#allocation2 + $0x1cc] ss:$16 sps:$4 sm:$0xff]   ;;  %v3022_v1 = vld [vmem:[#allocation2 + $0x584] ss:$16 sps:$4 sm:$0xff]  }
  0x48   :  { %1298 = vmatpush2.bf16.msra.mxu0 %v2946_v2  ;;  %1341 = vmatpush2.bf16.msra.mxu1 %v2947_v3  ;;  %v3017_v2 = vld [vmem:[#allocation2 + $0x1c8] ss:$16 sps:$4 sm:$0xff]   ;;  %v3020_v3 = vld [vmem:[#allocation2 + $0x580] ss:$16 sps:$4 sm:$0xff]  }
  0x49   :  { %1299 = vmatprep.subr.bf16.mxu0 %v2948_v4  ;;  %1342 = vmatprep.subr.bf16.mxu1 %v2950_v5  ;;  %v3025_v4 = vld [vmem:[#allocation2 + $0x1ac] ss:$16 sps:$4 sm:$0xff]   ;;  %v3028_v5 = vld [vmem:[#allocation2 + $0x564] ss:$16 sps:$4 sm:$0xff]  }
  0x4c   :  { %1300 = vmatpush2.bf16.msra.mxu0 %v2952_v6  ;;  %1343 = vmatpush2.bf16.msra.mxu1 %v2953_v7  ;;  %v3023_v6 = vld [vmem:[#allocation2 + $0x1a8] ss:$16 sps:$4 sm:$0xff]   ;;  %v3026_v7 = vld [vmem:[#allocation2 + $0x560] ss:$16 sps:$4 sm:$0xff]  }
  0x4d   :  { %1355 = vmatprep.subr.bf16.mxu0 %v2956_v12  ;;  %1412 = vmatprep.subr.bf16.mxu1 %v2959_v13  ;;  %v3037_v12 = vld [vmem:[#allocation2 + $0x16c] ss:$16 sps:$4 sm:$0xff]   ;;  %v3040_v13 = vld [vmem:[#allocation2 + $0x524] ss:$16 sps:$4 sm:$0xff]  }
  0x4f   :  { %1302 = vmatmul.mubr.bf16.vlgmr.msra.gmra.mxu0 %v3388_v14  ;;  %1345 = vmatmul.mubr.bf16.vlgmr.msra.gmra.mxu1 %v3390_v15 }
  0x50   :  { %1356 = vmatpush1.bf16.msra.mxu0 %v2954_v16  ;;  %1413 = vmatpush1.bf16.msra.mxu1 %v2957_v17  ;;  %v3035_v16 = vld [vmem:[#allocation2 + $0x168] ss:$16 sps:$4 sm:$0xff]   ;;  %v3038_v17 = vld [vmem:[#allocation2 + $0x520] ss:$16 sps:$4 sm:$0xff]  }
  0x51   :  { %1357 = vmatprep.subr.bf16.mxu0 %v2962_v18  ;;  %1430 = vmatprep.mubr.bf16.mxu1 %v3305_v0  ;;  %v3043_v18 = vld [vmem:[#allocation2 + $0x14c] ss:$16 sps:$4 sm:$0xff]  }
  0x52   :  { %1441 = vmatprep.subr.bf16.mxu1 %v2965_v19  ;;  %1387 = vmatprep.mubr.bf16.mxu0 %v3412_v45  ;;  %v3046_v19 = vld [vmem:[#allocation2 + $0x504] ss:$16 sps:$4 sm:$0xff]  }
  0x54   :  { %1358 = vmatpush1.bf16.msra.mxu0 %v2960_v20  ;;  %v3041_v20 = vld [vmem:[#allocation2 + $0x148] ss:$16 sps:$4 sm:$0xff]  }
  0x55   :  { %1359 = vmatprep.subr.bf16.mxu0 %v2968_v23  ;;  %v54_v23 = vld [vmem:[%s3764_s0 + $0x58] sm:$0xff] }
  0x57   :  { %2692 = vmatmul.mubr.msk.bf16.vlgmr.msra.gmra.mxu1 %vm1265_vm0, %v3401_v24 }
  0x58   :  { %1442 = vmatpush1.bf16.msra.mxu1 %v2963_v25  ;;  %1360 = vmatpush1.bf16.msra.mxu0 %v2966_v26  ;;  %v3049_v25 = vld [vmem:[#allocation2 + $0x12c] ss:$16 sps:$4 sm:$0xff]  }
  0x59   :  { %1443 = vmatprep.subr.bf16.mxu1 %v2971_v27  ;;  %1361 = vmatprep.subr.bf16.mxu0 %v2974_v28  ;;  %v3052_v26 = vld [vmem:[#allocation2 + $0x2ec] ss:$16 sps:$4 sm:$0xff]   ;;  %v3421_v27 = vpack.c.bf16 %v54_v23, %v47_v22  ;;  %v3047_v28 = vld [vmem:[#allocation2 + $0x128] ss:$16 sps:$4 sm:$0xff]  }
  0x5a   :  { %1473 = vmatprep.mubr.bf16.mxu1 %v3370_v54  ;;  %v3007_v54 = vld [vmem:[#allocation2 + $0xc] ss:$16 sps:$4 sm:$0xff]   ;;  %v3131_v22 = vld [vmem:[#allocation2 + $0x568] ss:$16 sps:$4 sm:$0xff]  }
  0x5b   :  { %v3134_v23 = vld [vmem:[#allocation2 + $0x328] ss:$16 sps:$4 sm:$0xff]  }
  0x5c   :  { %1444 = vmatpush1.bf16.msra.mxu1 %v2969_v29  ;;  %1362 = vmatpush1.bf16.msra.mxu0 %v2972_v30  ;;  %v3050_v29 = vld [vmem:[#allocation2 + $0x2e8] ss:$16 sps:$4 sm:$0xff]   ;;  %v3055_v30 = vld [vmem:[#allocation2 + $0x10c] ss:$16 sps:$4 sm:$0xff]  }
  0x5d   :  { %1445 = vmatprep.subr.bf16.mxu1 %v2977_v31  ;;  %1363 = vmatprep.subr.bf16.mxu0 %v2980_v32  ;;  %v3058_v31 = vld [vmem:[#allocation2 + $0x2cc] ss:$16 sps:$4 sm:$0xff]   ;;  %v3053_v32 = vld [vmem:[#allocation2 + $0x108] ss:$16 sps:$4 sm:$0xff]  }
  0x60   :  { %1446 = vmatpush1.bf16.msra.mxu1 %v2975_v33  ;;  %1364 = vmatpush1.bf16.msra.mxu0 %v2978_v34  ;;  %v3056_v33 = vld [vmem:[#allocation2 + $0x2c8] ss:$16 sps:$4 sm:$0xff]   ;;  %v3061_v34 = vld [vmem:[#allocation2 + $0x4ec] ss:$16 sps:$4 sm:$0xff]  }
  0x61   :  { %1447 = vmatprep.subr.bf16.mxu1 %v2983_v35  ;;  %1365 = vmatprep.subr.bf16.mxu0 %v2986_v36  ;;  %v3064_v35 = vld [vmem:[#allocation2 + $0x2ac] ss:$16 sps:$4 sm:$0xff]   ;;  %v3059_v36 = vld [vmem:[#allocation2 + $0x4e8] ss:$16 sps:$4 sm:$0xff]  }
  0x64   :  { %1448 = vmatpush1.bf16.msra.mxu1 %v2981_v37  ;;  %1366 = vmatpush1.bf16.msra.mxu0 %v2984_v38  ;;  %v3062_v37 = vld [vmem:[#allocation2 + $0x2a8] ss:$16 sps:$4 sm:$0xff]   ;;  %v3067_v38 = vld [vmem:[#allocation2 + $0x4cc] ss:$16 sps:$4 sm:$0xff]  }
  0x65   :  { %1449 = vmatprep.subr.bf16.mxu1 %v2989_v39  ;;  %1367 = vmatprep.subr.bf16.mxu0 %v2992_v40  ;;  %v3070_v39 = vld [vmem:[#allocation2 + $0x28c] ss:$16 sps:$4 sm:$0xff]   ;;  %v3065_v40 = vld [vmem:[#allocation2 + $0x4c8] ss:$16 sps:$4 sm:$0xff]  }
  0x68   :  { %1450 = vmatpush1.bf16.msra.mxu1 %v2987_v41  ;;  %1368 = vmatpush1.bf16.msra.mxu0 %v2990_v44  ;;  %v3068_v41 = vld [vmem:[#allocation2 + $0x288] ss:$16 sps:$4 sm:$0xff]  }
  0x69   :  { %1451 = vmatprep.subr.bf16.mxu1 %v2995_v46  ;;  %1369 = vmatprep.subr.bf16.mxu0 %v2998_v47  ;;  %v3071_v44 = vld [vmem:[#allocation2 + $0x4a8] ss:$16 sps:$4 sm:$0xff]   ;;  %v3082_v47 = vld [vmem:[#allocation2 + $0x24c] ss:$16 sps:$4 sm:$0xff]  }
  0x6a   :  { %v3074_v46 = vld [vmem:[#allocation2 + $0x268] ss:$16 sps:$4 sm:$0xff]  }
  0x6c   :  { %1452 = vmatpush1.bf16.msra.mxu1 %v2993_v48  ;;  %1370 = vmatpush1.bf16.msra.mxu0 %v2996_v49  ;;  %v3077_v48 = vld [vmem:[#allocation2 + $0x488] ss:$16 sps:$4 sm:$0xff]   ;;  %v3085_v49 = vld [vmem:[#allocation2 + $0x46c] ss:$16 sps:$4 sm:$0xff]  }
  0x6d   :  { %1453 = vmatprep.subr.bf16.mxu1 %v3001_v50  ;;  %1371 = vmatprep.subr.bf16.mxu0 %v3004_v51  ;;  %v3088_v50 = vld [vmem:[#allocation2 + $0x22c] ss:$16 sps:$4 sm:$0xff]   ;;  %v3083_v51 = vld [vmem:[#allocation2 + $0x468] ss:$16 sps:$4 sm:$0xff]  }
  0x70   :  { %1454 = vmatpush1.bf16.msra.mxu1 %v2999_v52  ;;  %1372 = vmatpush2.bf16.msra.mxu0 %v3002_v53  ;;  %v3086_v52 = vld [vmem:[#allocation2 + $0x228] ss:$16 sps:$4 sm:$0xff]   ;;  %v3091_v53 = vld [vmem:[#allocation2 + $0x44c] ss:$16 sps:$4 sm:$0xff]  }
  0x71   :  { %1455 = vmatprep.subr.bf16.mxu1 %v3007_v54  ;;  %1373 = vmatprep.subr.bf16.mxu0 %v3010_v56  ;;  %v3089_v54 = vld [vmem:[#allocation2 + $0x448] ss:$16 sps:$4 sm:$0xff]  }
  0x72   :  { %v3092_v56 = vld [vmem:[#allocation2 + $0x208] ss:$16 sps:$4 sm:$0xff]  }
  0x74   :  { %1456 = vmatpush1.bf16.msra.mxu1 %v3005_v57  ;;  %1374 = vmatpush2.bf16.msra.mxu0 %v3008_v58  ;;  %v3097_v57 = vld [vmem:[#allocation2 + $0x42c] ss:$16 sps:$4 sm:$0xff]  }
  0x75   :  { %1457 = vmatprep.subr.bf16.mxu1 %v3013_v59  ;;  %1375 = vmatprep.subr.bf16.mxu0 %v3016_v60  ;;  %v3100_v58 = vld [vmem:[#allocation2 + $0x3ec] ss:$16 sps:$4 sm:$0xff]   ;;  %v3095_v59 = vld [vmem:[#allocation2 + $0x428] ss:$16 sps:$4 sm:$0xff]  }
  0x76   :  { %v3098_v60 = vld [vmem:[#allocation2 + $0x3e8] ss:$16 sps:$4 sm:$0xff]  }
  0x78   :  { %1458 = vmatpush2.bf16.msra.mxu1 %v3011_v61  ;;  %1376 = vmatpush2.bf16.msra.mxu0 %v3014_v62  ;;  %v3103_v61 = vld [vmem:[#allocation2 + $0x40c] ss:$16 sps:$4 sm:$0xff]  }
  0x79   :  { %1459 = vmatprep.subr.bf16.mxu1 %v3019_v63  ;;  %1377 = vmatprep.subr.bf16.mxu0 %v3022_v1  ;;  %v3106_v62 = vld [vmem:[#allocation2 + $0x3cc] ss:$16 sps:$4 sm:$0xff]   ;;  %v3101_v63 = vld [vmem:[#allocation2 + $0x408] ss:$16 sps:$4 sm:$0xff]  }
  0x7a   :  { %v3104_v1 = vld [vmem:[#allocation2 + $0x3c8] ss:$16 sps:$4 sm:$0xff]  }
  0x7c   :  { %1460 = vmatpush2.bf16.msra.mxu1 %v3017_v2  ;;  %1378 = vmatpush2.bf16.msra.mxu0 %v3020_v3  ;;  %v3109_v2 = vld [vmem:[#allocation2 + $0x5ec] ss:$16 sps:$4 sm:$0xff]  }
  0x7d   :  { %1461 = vmatprep.subr.bf16.mxu1 %v3025_v4  ;;  %1379 = vmatprep.subr.bf16.mxu0 %v3028_v5  ;;  %v3112_v3 = vld [vmem:[#allocation2 + $0x3ac] ss:$16 sps:$4 sm:$0xff]   ;;  %v3107_v4 = vld [vmem:[#allocation2 + $0x5e8] ss:$16 sps:$4 sm:$0xff]  }
  0x7e   :  { %v3110_v5 = vld [vmem:[#allocation2 + $0x3a8] ss:$16 sps:$4 sm:$0xff]  }
  0x80   :  { %1462 = vmatpush2.bf16.msra.mxu1 %v3023_v6  ;;  %1380 = vmatpush2.bf16.msra.mxu0 %v3026_v7  ;;  %v3115_v6 = vld [vmem:[#allocation2 + $0x5cc] ss:$16 sps:$4 sm:$0xff]  }
  0x81   :  { %1463 = vmatprep.subr.bf16.mxu1 %v3031_v8  ;;  %1381 = vmatprep.subr.bf16.mxu0 %v3034_v9  ;;  %v3118_v7 = vld [vmem:[#allocation2 + $0x38c] ss:$16 sps:$4 sm:$0xff]   ;;  %v3113_v8 = vld [vmem:[#allocation2 + $0x5c8] ss:$16 sps:$4 sm:$0xff]  }
  0x82   :  { %v3116_v9 = vld [vmem:[#allocation2 + $0x388] ss:$16 sps:$4 sm:$0xff]  }
  0x84   :  { %1464 = vmatpush2.bf16.msra.mxu1 %v3029_v10  ;;  %1382 = vmatpush2.bf16.msra.mxu0 %v3032_v11  ;;  %v3121_v10 = vld [vmem:[#allocation2 + $0x5ac] ss:$16 sps:$4 sm:$0xff]  }
  0x85   :  { %1465 = vmatprep.subr.bf16.mxu1 %v3037_v12  ;;  %1383 = vmatprep.subr.bf16.mxu0 %v3040_v13  ;;  %v3124_v11 = vld [vmem:[#allocation2 + $0x36c] ss:$16 sps:$4 sm:$0xff]   ;;  %v3119_v12 = vld [vmem:[#allocation2 + $0x5a8] ss:$16 sps:$4 sm:$0xff]  }
  0x86   :  { %v3122_v13 = vld [vmem:[#allocation2 + $0x368] ss:$16 sps:$4 sm:$0xff]  }
  0x88   :  { %1466 = vmatpush2.bf16.msra.mxu1 %v3035_v16  ;;  %1384 = vmatpush2.bf16.msra.mxu0 %v3038_v17  ;;  %v3127_v16 = vld [vmem:[#allocation2 + $0x58c] ss:$16 sps:$4 sm:$0xff]  }
  0x89   :  { %1467 = vmatprep.subr.bf16.mxu1 %v3043_v18  ;;  %1385 = vmatprep.subr.bf16.mxu0 %v3046_v19  ;;  %v3130_v17 = vld [vmem:[#allocation2 + $0x34c] ss:$16 sps:$4 sm:$0xff]   ;;  %v3125_v18 = vld [vmem:[#allocation2 + $0x588] ss:$16 sps:$4 sm:$0xff]  }
  0x8a   :  { %v3128_v19 = vld [vmem:[#allocation2 + $0x348] ss:$16 sps:$4 sm:$0xff]  }
  0x8c   :  { %1468 = vmatpush2.bf16.msra.mxu1 %v3041_v20  ;;  %1386 = vmatpush2.bf16.msra.mxu0 %v3044_v21  ;;  %v3133_v20 = vld [vmem:[#allocation2 + $0x56c] ss:$16 sps:$4 sm:$0xff]  }
  0x8d   :  { %1469 = vmatprep.subr.bf16.mxu1 %v3049_v25  ;;  %1484 = vmatprep.subr.bf16.mxu0 %v3052_v26  ;;  %v3136_v21 = vld [vmem:[#allocation2 + $0x32c] ss:$16 sps:$4 sm:$0xff]  }
  0x8e   :  { %v3139_v25 = vld [vmem:[#allocation2 + $0x54c] ss:$16 sps:$4 sm:$0xff]  }
  0x8f   :  { %1388 = vmatmul.mubr.bf16.vlgmr.msra.gmra.mxu0 %v3421_v27  ;;  %v3142_v26 = vld [vmem:[#allocation2 + $0x30c] ss:$16 sps:$4 sm:$0xff]  }
  0x90   :  { %1470 = vmatpush2.bf16.msra.mxu1 %v3047_v28  ;;  %1485 = vmatpush1.bf16.msra.mxu0 %v3050_v29  ;;  %v3137_v28 = vld [vmem:[#allocation2 + $0x548] ss:$16 sps:$4 sm:$0xff]  }
  0x91   :  { %1471 = vmatprep.subr.bf16.mxu1 %v3055_v30  ;;  %1486 = vmatprep.subr.bf16.mxu0 %v3058_v31  ;;  %v3140_v29 = vld [vmem:[#allocation2 + $0x308] ss:$16 sps:$4 sm:$0xff]   ;;  %v3145_v30 = vld [vmem:[#allocation2 + $0x52c] ss:$16 sps:$4 sm:$0xff]  }
  0x92   :  { %1516 = vmatprep.mubr.bf16.mxu0 %v3372_v55  ;;  %v3079_v55 = vld [vmem:[#allocation2 + $0x48c] ss:$16 sps:$4 sm:$0xff]  }
  0x93   :  { %v3148_v31 = vld [vmem:[#allocation2 + $0x60c] ss:$16 sps:$4 sm:$0xff]  }
  0x94   :  { %1472 = vmatpush2.bf16.msra.mxu1 %v3053_v32  ;;  %1487 = vmatpush1.bf16.msra.mxu0 %v3056_v33  ;;  %v3143_v32 = vld [vmem:[#allocation2 + $0x528] ss:$16 sps:$4 sm:$0xff]  }
  0x95   :  { %1527 = vmatprep.subr.bf16.mxu1 %v3061_v34  ;;  %1488 = vmatprep.subr.bf16.mxu0 %v3064_v35  ;;  %v3146_v33 = vld [vmem:[#allocation2 + $0x608] ss:$16 sps:$4 sm:$0xff]   ;;  %v3151_v34 = vld [vmem:[#allocation2 + $0x50c] ss:$16 sps:$4 sm:$0xff]  }
  0x96   :  { %v3154_v35 = vld [vmem:[%s3767_s3 + $0x74] ss:$8 sps:$4 sm:$0xff]  }
  0x97   :  { %1474 = vmatmul.mubr.bf16.vlgmr.msra.gmra.mxu1 %v3388_v14  ;;  %v3080_v14 = vld [vmem:[#allocation2 + $0x248] ss:$16 sps:$4 sm:$0xff]  }
  0x98   :  { %1528 = vmatpush1.bf16.msra.mxu1 %v3059_v36  ;;  %1489 = vmatpush1.bf16.msra.mxu0 %v3062_v37  ;;  %v3149_v36 = vld [vmem:[#allocation2 + $0x508] ss:$16 sps:$4 sm:$0xff]  }
  0x99   :  { %1529 = vmatprep.subr.bf16.mxu1 %v3067_v38  ;;  %1490 = vmatprep.subr.bf16.mxu0 %v3070_v39  ;;  %v3152_v37 = vld [vmem:[%s3767_s3 + $0x70] ss:$8 sps:$4 sm:$0xff]   ;;  %v3157_v38 = vld [vmem:[%s3767_s3 + $0x64] ss:$8 sps:$4 sm:$0xff]  }
  0x9a   :  { %1559 = vmatprep.mubr.bf16.mxu1 %v3412_v45  ;;  %v3094_v45 = vld [vmem:[#allocation2 + $0x20c] ss:$16 sps:$4 sm:$0xff]   ;;  %v3158_v39 = vld [vmem:[%s3767_s3 + $0x50] ss:$8 sps:$4 sm:$0xff]  }
  0x9c   :  { %1530 = vmatpush1.bf16.msra.mxu1 %v3065_v40  ;;  %1491 = vmatpush1.bf16.msra.mxu0 %v3068_v41  ;;  %v3202_v40 = vld [vmem:[%s3767_s3 + $0x174] ss:$8 sps:$4 sm:$0xff]   ;;  %v3161_v41 = vld [vmem:[%s3767_s3 + $0x40] ss:$8 sps:$4 sm:$0xff]  }
  0x9d   :  { %1531 = vmatprep.subr.bf16.mxu1 %v3073_v42  ;;  %1492 = vmatprep.subr.bf16.mxu0 %v3076_v43  ;;  %v3205_v42 = vld [vmem:[%s3767_s3 + $0x164] ss:$8 sps:$4 sm:$0xff]   ;;  %v3166_v43 = vld [vmem:[%s3767_s3 + $0x34] ss:$8 sps:$4 sm:$0xff]  }
  0xa0   :  { %1532 = vmatpush1.bf16.msra.mxu1 %v3071_v44  ;;  %1493 = vmatpush1.bf16.msra.mxu0 %v3074_v46  ;;  %v3203_v44 = vld [vmem:[%s3767_s3 + $0x160] ss:$8 sps:$4 sm:$0xff]   ;;  %v3208_v46 = vld [vmem:[%s3767_s3 + $0x154] ss:$8 sps:$4 sm:$0xff]  }
  0xa1   :  { %1533 = vmatprep.subr.bf16.mxu1 %v3079_v55  ;;  %1494 = vmatprep.subr.bf16.mxu0 %v3082_v47  ;;  %v3164_v55 = vld [vmem:[%s3767_s3 + $0x30] ss:$8 sps:$4 sm:$0xff]   ;;  %v3169_v47 = vld [vmem:[%s3767_s3 + $0x24] ss:$8 sps:$4 sm:$0xff]  }
  0xa4   :  { %1534 = vmatpush1.bf16.msra.mxu1 %v3077_v48  ;;  %1495 = vmatpush1.bf16.msra.mxu0 %v3080_v14  ;;  %v3206_v48 = vld [vmem:[%s3767_s3 + $0x150] ss:$8 sps:$4 sm:$0xff]   ;;  %v3211_v14 = vld [vmem:[%s3767_s3 + $0x144] ss:$8 sps:$4 sm:$0xff]  }
  0xa5   :  { %1535 = vmatprep.subr.bf16.mxu1 %v3085_v49  ;;  %1496 = vmatprep.subr.bf16.mxu0 %v3088_v50  ;;  %v3167_v49 = vld [vmem:[%s3767_s3 + $0x20] ss:$8 sps:$4 sm:$0xff]   ;;  %v3172_v50 = vld [vmem:[%s3767_s3 + $0x14] ss:$8 sps:$4 sm:$0xff]  }
  0xa8   :  { %1536 = vmatpush1.bf16.msra.mxu1 %v3083_v51  ;;  %1497 = vmatpush1.bf16.msra.mxu0 %v3086_v52  ;;  %v3209_v51 = vld [vmem:[%s3767_s3 + $0x140] ss:$8 sps:$4 sm:$0xff]   ;;  %v3214_v52 = vld [vmem:[%s3767_s3 + $0x134] ss:$8 sps:$4 sm:$0xff]  }
  0xa9   :  { %1537 = vmatprep.subr.bf16.mxu1 %v3091_v53  ;;  %1498 = vmatprep.subr.bf16.mxu0 %v3094_v45  ;;  %v3170_v53 = vld [vmem:[%s3767_s3 + $0x10] ss:$8 sps:$4 sm:$0xff]   ;;  %v3175_v45 = vld [vmem:[%s3767_s3 + $0x4] ss:$8 sps:$4 sm:$0xff]  }
  0xac   :  { %1538 = vmatpush1.bf16.msra.mxu1 %v3089_v54  ;;  %1499 = vmatpush1.bf16.msra.mxu0 %v3092_v56  ;;  %v3212_v54 = vld [vmem:[%s3767_s3 + $0x130] ss:$8 sps:$4 sm:$0xff]   ;;  %v3217_v56 = vld [vmem:[%s3767_s3 + $0x124] ss:$8 sps:$4 sm:$0xff]  }
  0xad   :  { %1539 = vmatprep.subr.bf16.mxu1 %v3097_v57  ;;  %1500 = vmatprep.subr.bf16.mxu0 %v3100_v58  ;;  %v3173_v57 = vld [vmem:[%s3767_s3] ss:$8 sps:$4 sm:$0xff]   ;;  %v3178_v58 = vld [vmem:[%s3767_s3 + $0xf4] ss:$8 sps:$4 sm:$0xff]  }
  0xb0   :  { %1540 = vmatpush1.bf16.msra.mxu1 %v3095_v59  ;;  %1501 = vmatpush2.bf16.msra.mxu0 %v3098_v60  ;;  %v3215_v59 = vld [vmem:[%s3767_s3 + $0x120] ss:$8 sps:$4 sm:$0xff]   ;;  %v3220_v60 = vld [vmem:[%s3767_s3 + $0x114] ss:$8 sps:$4 sm:$0xff]  }
  0xb1   :  { %1541 = vmatprep.subr.bf16.mxu1 %v3103_v61  ;;  %1502 = vmatprep.subr.bf16.mxu0 %v3106_v62  ;;  %v3176_v61 = vld [vmem:[%s3767_s3 + $0xf0] ss:$8 sps:$4 sm:$0xff]   ;;  %v3181_v62 = vld [vmem:[%s3767_s3 + $0xe4] ss:$8 sps:$4 sm:$0xff]  }
  0xb4   :  { %1542 = vmatpush1.bf16.msra.mxu1 %v3101_v63  ;;  %1503 = vmatpush2.bf16.msra.mxu0 %v3104_v1  ;;  %v3218_v63 = vld [vmem:[%s3767_s3 + $0x110] ss:$8 sps:$4 sm:$0xff]   ;;  %v3223_v1 = vld [vmem:[%s3767_s3 + $0x104] ss:$8 sps:$4 sm:$0xff]  }
  0xb5   :  { %1543 = vmatprep.subr.bf16.mxu1 %v3109_v2  ;;  %1504 = vmatprep.subr.bf16.mxu0 %v3112_v3  ;;  %v3179_v2 = vld [vmem:[%s3767_s3 + $0xe0] ss:$8 sps:$4 sm:$0xff]   ;;  %v3184_v3 = vld [vmem:[%s3767_s3 + $0xd4] ss:$8 sps:$4 sm:$0xff]  }
  0xb8   :  { %1544 = vmatpush2.bf16.msra.mxu1 %v3107_v4  ;;  %1505 = vmatpush2.bf16.msra.mxu0 %v3110_v5  ;;  %v3221_v4 = vld [vmem:[%s3767_s3 + $0x100] ss:$8 sps:$4 sm:$0xff]   ;;  %v3226_v5 = vld [vmem:[%s3767_s3 + $0x1f4] ss:$8 sps:$4 sm:$0xff]  }
  0xb9   :  { %1545 = vmatprep.subr.bf16.mxu1 %v3115_v6  ;;  %1506 = vmatprep.subr.bf16.mxu0 %v3118_v7  ;;  %v3182_v6 = vld [vmem:[%s3767_s3 + $0xd0] ss:$8 sps:$4 sm:$0xff]   ;;  %v3187_v7 = vld [vmem:[%s3767_s3 + $0xc4] ss:$8 sps:$4 sm:$0xff]  }
  0xbc   :  { %1546 = vmatpush2.bf16.msra.mxu1 %v3113_v8  ;;  %1507 = vmatpush2.bf16.msra.mxu0 %v3116_v9  ;;  %v3224_v8 = vld [vmem:[%s3767_s3 + $0x1f0] ss:$8 sps:$4 sm:$0xff]   ;;  %v3229_v9 = vld [vmem:[%s3767_s3 + $0x1e4] ss:$8 sps:$4 sm:$0xff]  }
  0xbd   :  { %1547 = vmatprep.subr.bf16.mxu1 %v3121_v10  ;;  %1508 = vmatprep.subr.bf16.mxu0 %v3124_v11  ;;  %v3185_v10 = vld [vmem:[%s3767_s3 + $0xc0] ss:$8 sps:$4 sm:$0xff]   ;;  %v3190_v11 = vld [vmem:[%s3767_s3 + $0xb4] ss:$8 sps:$4 sm:$0xff]  }
  0xc0   :  { %1548 = vmatpush2.bf16.msra.mxu1 %v3119_v12  ;;  %1509 = vmatpush2.bf16.msra.mxu0 %v3122_v13  ;;  %v3227_v12 = vld [vmem:[%s3767_s3 + $0x1e0] ss:$8 sps:$4 sm:$0xff]   ;;  %v3232_v13 = vld [vmem:[%s3767_s3 + $0x1d4] ss:$8 sps:$4 sm:$0xff]  }
  0xc1   :  { %1549 = vmatprep.subr.bf16.mxu1 %v3127_v16  ;;  %1510 = vmatprep.subr.bf16.mxu0 %v3130_v17  ;;  %v3188_v16 = vld [vmem:[%s3767_s3 + $0xb0] ss:$8 sps:$4 sm:$0xff]   ;;  %v3193_v17 = vld [vmem:[%s3767_s3 + $0xa4] ss:$8 sps:$4 sm:$0xff]  }
  0xc4   :  { %1550 = vmatpush2.bf16.msra.mxu1 %v3125_v18  ;;  %1511 = vmatpush2.bf16.msra.mxu0 %v3128_v19  ;;  %v3230_v18 = vld [vmem:[%s3767_s3 + $0x1d0] ss:$8 sps:$4 sm:$0xff]   ;;  %v3191_v19 = vld [vmem:[%s3767_s3 + $0xa0] ss:$8 sps:$4 sm:$0xff]  }
  0xc5   :  { %1551 = vmatprep.subr.bf16.mxu1 %v3133_v20  ;;  %1512 = vmatprep.subr.bf16.mxu0 %v3136_v21  ;;  %v3196_v20 = vld [vmem:[%s3767_s3 + $0x94] ss:$8 sps:$4 sm:$0xff]   ;;  %v3194_v21 = vld [vmem:[%s3767_s3 + $0x90] ss:$8 sps:$4 sm:$0xff]  }
  0xc8   :  { %1552 = vmatpush2.bf16.msra.mxu1 %v3131_v22  ;;  %1513 = vmatpush2.bf16.msra.mxu0 %v3134_v23  ;;  %v3199_v22 = vld [vmem:[%s3767_s3 + $0x84] ss:$8 sps:$4 sm:$0xff]   ;;  %v3197_v23 = vld [vmem:[%s3767_s3 + $0x80] ss:$8 sps:$4 sm:$0xff]  }
  0xc9   :  { %1553 = vmatprep.subr.bf16.mxu1 %v3139_v25  ;;  %1514 = vmatprep.subr.bf16.mxu0 %v3142_v26  ;;  %v3235_v25 = vld [vmem:[%s3767_s3 + $0x1c4] ss:$8 sps:$4 sm:$0xff]   ;;  %v3233_v26 = vld [vmem:[%s3767_s3 + $0x1c0] ss:$8 sps:$4 sm:$0xff]  }
  0xcc   :  { %1554 = vmatpush2.bf16.msra.mxu1 %v3137_v28  ;;  %1515 = vmatpush2.bf16.msra.mxu0 %v3140_v29  ;;  %v3238_v28 = vld [vmem:[%s3767_s3 + $0x1b4] ss:$8 sps:$4 sm:$0xff]   ;;  %v3236_v29 = vld [vmem:[%s3767_s3 + $0x1b0] ss:$8 sps:$4 sm:$0xff]  }
  0xcd   :  { %1555 = vmatprep.subr.bf16.mxu1 %v3145_v30  ;;  %1584 = vmatprep.subr.bf16.mxu0 %v3148_v31  ;;  %v3241_v30 = vld [vmem:[%s3767_s3 + $0x1a4] ss:$8 sps:$4 sm:$0xff]   ;;  %v3239_v31 = vld [vmem:[%s3767_s3 + $0x1a0] ss:$8 sps:$4 sm:$0xff]  }
  0xcf   :  { %1517 = vmatmul.mubr.bf16.vlgmr.msra.gmra.mxu0 %v3390_v15  ;;  %v3160_v15 = vld [vmem:[%s3767_s3 + $0x54] ss:$8 sps:$4 sm:$0xff]  }
  0xd0   :  { %1556 = vmatpush2.bf16.msra.mxu1 %v3143_v32  ;;  %1585 = vmatpush1.bf16.msra.mxu0 %v3146_v33  ;;  %v3244_v32 = vld [vmem:[%s3767_s3 + $0x194] ss:$8 sps:$4 sm:$0xff]   ;;  %v3242_v33 = vld [vmem:[%s3767_s3 + $0x190] ss:$8 sps:$4 sm:$0xff]  }
  0xd1   :  { %1557 = vmatprep.subr.bf16.mxu1 %v3151_v34  ;;  %1602 = vmatprep.mubr.bf16.mxu0 %v3305_v0  ;;  %v3155_v0 = vld [vmem:[%s3767_s3 + $0x60] ss:$8 sps:$4 sm:$0xff]   ;;  %v3247_v34 = vld [vmem:[%s3767_s3 + $0x184] ss:$8 sps:$4 sm:$0xff]  }
  0xd2   :  { %2020 = vmatprep.subr.bf16.mxu0 %v3154_v35  ;;  %v3245_v35 = vld [vmem:[%s3767_s3 + $0x180] ss:$8 sps:$4 sm:$0xff]  }
  0xd4   :  { %1558 = vmatpush2.bf16.msra.mxu1 %v3149_v36 }
  0xd5   :  { %2063 = vmatprep.subr.bf16.mxu1 %v3202_v40 }
  0xd7   :  { %1560 = vmatmul.mubr.bf16.vlgmr.msra.gmra.mxu1 %v3421_v27  ;;  %2693 = vmatmul.mubr.msk.bf16.vlgmr.msra.gmra.mxu0 %vm1265_vm0, %v3401_v24  ;;  %v3163_v24 = vld [vmem:[%s3767_s3 + $0x44] ss:$8 sps:$4 sm:$0xff]   ;;  %v3200_v27 = vld [vmem:[%s3767_s3 + $0x170] ss:$8 sps:$4 sm:$0xff]  }
  0xd8   :  { %2021 = vmatpush1.bf16.msra.mxu0 %v3152_v37  ;;  %2064 = vmatpush1.bf16.msra.mxu1 %v3200_v27  ;;  %v265_v37 = vlaneseq }
  0xd9   :  { %2022 = vmatprep.subr.bf16.mxu0 %v3157_v38  ;;  %2065 = vmatprep.subr.bf16.mxu1 %v3205_v42 }
  0xdc   :  { %2023 = vmatpush1.bf16.msra.mxu0 %v3155_v0  ;;  %2066 = vmatpush1.bf16.msra.mxu1 %v3203_v44  ;;  %v3625_v0 = vshrl.u32 %v265_v37, 7 }
  0xdd   :  { %2024 = vmatprep.subr.bf16.mxu0 %v3160_v15  ;;  %2067 = vmatprep.subr.bf16.mxu1 %v3208_v46 }
  0xde   :  { %v267_v27 = vsub.s32 0, %v3625_v0  ;;  %vm2481_vm8 = vcmp.eq.s32.totalorder %v3625_v0, 0 }
  0xe0   :  { %2025 = vmatpush1.bf16.msra.mxu0 %v3158_v39  ;;  %2068 = vmatpush1.bf16.msra.mxu1 %v3206_v48 }
  0xe1   :  { %2026 = vmatprep.subr.bf16.mxu0 %v3163_v24  ;;  %2069 = vmatprep.subr.bf16.mxu1 %v3211_v14  ;;  %v271_v24 = vsub.s32 1, %v3625_v0 }
  0xe4   :  { %2027 = vmatpush1.bf16.msra.mxu0 %v3161_v41  ;;  %2070 = vmatpush1.bf16.msra.mxu1 %v3209_v51  ;;  %v64_v41 = vld [vmem:[%s3770_s6] sm:$0xf] }
  0xe5   :  { %2028 = vmatprep.subr.bf16.mxu0 %v3166_v43  ;;  %2071 = vmatprep.subr.bf16.mxu1 %v3214_v52  ;;  %v272_v43 = vrot.slane %v64_v41, %v271_v24  ;;  %v268_v44 = vrot.slane %v64_v41, %v267_v27 }
  0xe8   :  { %2029 = vmatpush1.bf16.msra.mxu0 %v3164_v55  ;;  %2072 = vmatpush1.bf16.msra.mxu1 %v3212_v54 }
  0xe9   :  { %2030 = vmatprep.subr.bf16.mxu0 %v3169_v47  ;;  %2073 = vmatprep.subr.bf16.mxu1 %v3217_v56 }
  0xec   :  { %2031 = vmatpush1.bf16.msra.mxu0 %v3167_v49  ;;  %2074 = vmatpush1.bf16.msra.mxu1 %v3215_v59 }
  0xed   :  { %2032 = vmatprep.subr.bf16.mxu0 %v3172_v50  ;;  %2075 = vmatprep.subr.bf16.mxu1 %v3220_v60 }
  0xf0   :  { %2033 = vmatpush1.bf16.msra.mxu0 %v3170_v53  ;;  %2076 = vmatpush1.bf16.msra.mxu1 %v3218_v63 }
  0xf1   :  { %2034 = vmatprep.subr.bf16.mxu0 %v3175_v45  ;;  %2077 = vmatprep.subr.bf16.mxu1 %v3223_v1 }
  0xf4   :  { %2035 = vmatpush1.bf16.msra.mxu0 %v3173_v57  ;;  %2078 = vmatpush1.bf16.msra.mxu1 %v3221_v4 }
  0xf5   :  { %2036 = vmatprep.subr.bf16.mxu0 %v3178_v58  ;;  %2079 = vmatprep.subr.bf16.mxu1 %v3226_v5 }
  0xf8   :  { %2037 = vmatpush2.bf16.msra.mxu0 %v3176_v61  ;;  %2080 = vmatpush2.bf16.msra.mxu1 %v3224_v8 }
  0xf9   :  { %2038 = vmatprep.subr.bf16.mxu0 %v3181_v62  ;;  %2081 = vmatprep.subr.bf16.mxu1 %v3229_v9 }
  0xfc   :  { %2039 = vmatpush2.bf16.msra.mxu0 %v3179_v2  ;;  %2082 = vmatpush2.bf16.msra.mxu1 %v3227_v12 }
  0xfd   :  { %2040 = vmatprep.subr.bf16.mxu0 %v3184_v3  ;;  %2083 = vmatprep.subr.bf16.mxu1 %v3232_v13 }
 0x100   :  { %2041 = vmatpush2.bf16.msra.mxu0 %v3182_v6  ;;  %2084 = vmatpush2.bf16.msra.mxu1 %v3230_v18  ;;  %v275_v18 = vsub.s32 2, %v3625_v0 }
 0x101   :  { %2042 = vmatprep.subr.bf16.mxu0 %v3187_v7  ;;  %2085 = vmatprep.subr.bf16.mxu1 %v3235_v25 }
 0x104   :  { %2043 = vmatpush2.bf16.msra.mxu0 %v3185_v10  ;;  %2086 = vmatpush2.bf16.msra.mxu1 %v3233_v26 }
 0x105   :  { %2044 = vmatprep.subr.bf16.mxu0 %v3190_v11  ;;  %2087 = vmatprep.subr.bf16.mxu1 %v3238_v28 }
 0x108   :  { %2045 = vmatpush2.bf16.msra.mxu0 %v3188_v16  ;;  %2088 = vmatpush2.bf16.msra.mxu1 %v3236_v29 }
 0x109   :  { %2046 = vmatprep.subr.bf16.mxu0 %v3193_v17  ;;  %2089 = vmatprep.subr.bf16.mxu1 %v3241_v30  ;;  %v279_v17 = vsub.s32 3, %v3625_v0 }
 0x10c   :  { %2047 = vmatpush2.bf16.msra.mxu0 %v3191_v19  ;;  %2090 = vmatpush2.bf16.msra.mxu1 %v3239_v31 }
 0x10d   :  { %2048 = vmatprep.subr.bf16.mxu0 %v3196_v20  ;;  %2091 = vmatprep.subr.bf16.mxu1 %v3244_v32 }
 0x10f   :  { %v1346_v36 = vpop.f32.mrf.mxu1  ;;  %v1303_v15 = vpop.f32.mrf.mxu0 }
 0x110   :  { %2049 = vmatpush2.bf16.msra.mxu0 %v3194_v21  ;;  %2092 = vmatpush2.bf16.msra.mxu1 %v3242_v33  ;;  %v1304_v48 = vadd.f32 %v1303_v15, %v268_v44 }
 0x111   :  { %2050 = vmatprep.subr.bf16.mxu0 %v3199_v22  ;;  %2093 = vmatprep.subr.bf16.mxu1 %v3247_v34  ;;  %v1348_v38 = vpop.f32.mrf.mxu1  ;;  %v1305_v40 = vpop.f32.mrf.mxu0  ;;  %v280_v22 = vrot.slane %v64_v41, %v279_v17  ;;  %v3267_v17 = vld [vmem:[%s3769_s5 + $0x20] sm:$0xff]  }
 0x112   :  { %v1306_v47 = vadd.f32 %v1305_v40, %v272_v43  ;;  %v1347_v45 = vadd.f32 %v1346_v36, %v1304_v48 }
 0x113   :  { %v1350_v39 = vpop.f32.mrf.mxu1  ;;  %v1307_v46 = vpop.f32.mrf.mxu0 }
 0x114   :  { %2051 = vmatpush2.bf16.msra.mxu0 %v3197_v23  ;;  %2094 = vmatpush2.bf16.msra.mxu1 %v3245_v35  ;;  %v1308_v49 = vadd.f32 %v1307_v46, %v268_v44  ;;  %v1349_v52 = vadd.f32 %v1348_v38, %v1306_v47  ;;  %v276_v23 = vrot.slane %v64_v41, %v275_v18 }
 0x115   :  { %v1352_v42 = vpop.f32.mrf.mxu1  ;;  %v1309_v14 = vpop.f32.mrf.mxu0 }
 0x116   :  { %v1310_v53 = vadd.f32 %v1309_v14, %v272_v43  ;;  %v1351_v56 = vadd.f32 %v1350_v39, %v1308_v49 }
 0x117   :  { %v1432_v55 = vpop.f32.mrf.mxu1 }
 0x118   :  { %v1353_v61 = vadd.f32 %v1352_v42, %v1310_v53 }
 0x119   :  { %v1434_v50 = vpop.f32.mrf.mxu1 }
 0x11b   :  { %v1436_v58 = vpop.f32.mrf.mxu1 }
 0x11d   :  { %v1438_v4 = vpop.f32.mrf.mxu1 }
 0x14f   :  { %v1389_v51 = vpop.f32.mrf.mxu0 }
 0x150   :  { %v1390_v59 = vadd.f32 %v1389_v51, %v1347_v45 }
 0x151   :  { %v1391_v54 = vpop.f32.mrf.mxu0 }
 0x152   :  { %v1392_v57 = vadd.f32 %v1391_v54, %v1349_v52  ;;  %v1433_v5 = vadd.f32 %v1432_v55, %v1390_v59  ;;  %v3249_v59 = vld [vmem:[%s3768_s4 + $0x38] sm:$0xff]  }
 0x153   :  { %v1393_v60 = vpop.f32.mrf.mxu0 }
 0x154   :  { %v1394_v62 = vadd.f32 %v1393_v60, %v1351_v56  ;;  %v1435_v1 = vadd.f32 %v1434_v50, %v1392_v57  ;;  %v1613_v10 = vmax.f32 %v1433_v5, 0.0  ;;  %v3250_v60 = vld [vmem:[%s3768_s4 + $0x70] sm:$0xff]  }
 0x155   :  { %v1395_v63 = vpop.f32.mrf.mxu0  ;;  %v3258_v5 = vld [vmem:[%s3768_s4 + $0x50] sm:$0xff]  }
 0x156   :  { %v1437_v2 = vadd.f32 %v1436_v58, %v1394_v62  ;;  %v1396_v3 = vadd.f32 %v1395_v63, %v1353_v61  ;;  %v1614_v8 = vmax.f32 %v1435_v1, 0.0  ;;  %v3248_v58 = vld [vmem:[%s3768_s4 + $0x78] sm:$0xff]   ;;  %v3251_v61 = vld [vmem:[%s3768_s4 + $0x30] sm:$0xff]   ;;  %v3252_v62 = vld [vmem:[%s3768_s4 + $0x68] sm:$0xff]  }
 0x157   :  { %v1475_v13 = vpop.f32.mrf.mxu1  ;;  %2797 = vmatprep.subr.bf16.mxu0 %v3248_v58  ;;  %v3253_v63 = vld [vmem:[%s3768_s4 + $0x28] sm:$0xff]   ;;  %v3254_v1 = vld [vmem:[%s3768_s4 + $0x60] sm:$0xff]  }
 0x158   :  { %v1439_v6 = vadd.f32 %v1438_v4, %v1396_v3  ;;  %v1617_v7 = vmax.f32 %v1437_v2, 0.0  ;;  %v1476_v30 = vadd.f32 %v1475_v13, %v276_v23  ;;  %v3255_v2 = vld [vmem:[%s3768_s4 + $0x20] sm:$0xff]   ;;  %v3256_v3 = vld [vmem:[%s3768_s4 + $0x58] sm:$0xff]   ;;  %v3265_v13 = vld [vmem:[%s3769_s5 + $0x30] sm:$0xff]  }
 0x159   :  { %v1477_v16 = vpop.f32.mrf.mxu1  ;;  %v3257_v4 = vld [vmem:[%s3768_s4 + $0x18] sm:$0xff]  }
 0x15a   :  { %v1618_v9 = vmax.f32 %v1439_v6, 0.0  ;;  %v1621_v12 = vpack.c.bf16 %v1617_v7, %v1613_v10  ;;  %v1478_v29 = vadd.f32 %v1477_v16, %v280_v22  ;;  %v3259_v6 = vld [vmem:[%s3768_s4 + $0x10] sm:$0xff]   ;;  %v3260_v7 = vld [vmem:[%s3768_s4 + $0x48] sm:$0xff]   ;;  %v3263_v10 = vld [vmem:[%s3768_s4] sm:$0xff]  }
 0x15b   :  { %v1479_v20 = vpop.f32.mrf.mxu1  ;;  %v3266_v16 = vld [vmem:[%s3769_s5 + $0x28] sm:$0xff]  }
 0x15c   :  { %v1622_v11 = vpack.c.bf16 %v1618_v9, %v1614_v8  ;;  %v1480_v33 = vadd.f32 %v1479_v20, %v276_v23  ;;  %v3261_v8 = vld [vmem:[%s3768_s4 + $0x8] sm:$0xff]   ;;  %v3262_v9 = vld [vmem:[%s3768_s4 + $0x40] sm:$0xff]  }
 0x15d   :  { %v1481_v26 = vpop.f32.mrf.mxu1  ;;  %v65_v20 = vld [vmem:[%s3770_s6 + $0x4] sm:$0x3] }
 0x15e   :  { %2052 = vmatprep.mubr.bf16.mxu0 %v1622_v11  ;;  %v1482_v15 = vadd.f32 %v1481_v26, %v280_v22  ;;  %v3264_v11 = vld [vmem:[%s3769_s5 + $0x38] sm:$0xff]   ;;  %v1697_v22 = vrot.slane %v65_v20, %v271_v24  ;;  %v1693_v23 = vrot.slane %v65_v20, %v267_v27 }
 0x15f   :  { %2053 = vmatmul.mubr.bf16.vlgmr.msra.gmra.mxu0 %v1621_v12  ;;  %v3306_v12 = vmov 0.0   ;;  %v3268_v27 = vld [vmem:[%s3769_s5 + $0x18] sm:$0xff]  }
 0x160   :  { %2798 = vmatpush3.bf16.msra.mxu0 %v3249_v59  ;;  %2828 = vmatprep.subr.bf16.mxu1 %v3306_v12 }
 0x161   :  { %2799 = vmatprep.subr.bf16.mxu0 %v3250_v60  ;;  %v3742_v60 = vand.u32 127, %v265_v37 }
 0x163   :  { %vm2413_vm2 = vcmp.lt.s32.totalorder %v3742_v60, 10  ;;  %vm2482_vm9 = vcmp.eq.s32.totalorder %v3742_v60, 0 }
 0x164   :  { %2800 = vmatpush3.bf16.msra.mxu0 %v3251_v61  ;;  %v2775_v61 = vld [vmem:[%s3770_s6 + $0x7] ss:$0 sm:$0xff]  ;;  %vm2483_vm10 = vmand %vm2481_vm8, %vm2482_vm9 }
 0x165   :  { %2801 = vmatprep.subr.bf16.mxu0 %v3252_v62 }
 0x168   :  { %2802 = vmatpush3.bf16.msra.mxu0 %v3253_v63 }
 0x169   :  { %2803 = vmatprep.subr.bf16.mxu0 %v3254_v1 }
 0x16c   :  { %2804 = vmatpush3.bf16.msra.mxu0 %v3255_v2 }
 0x16d   :  { %2805 = vmatprep.subr.bf16.mxu0 %v3256_v3 }
 0x170   :  { %2806 = vmatpush3.bf16.msra.mxu0 %v3257_v4 }
 0x171   :  { %2807 = vmatprep.subr.bf16.mxu0 %v3258_v5 }
 0x174   :  { %2808 = vmatpush3.bf16.msra.mxu0 %v3259_v6 }
 0x175   :  { %2809 = vmatprep.subr.bf16.mxu0 %v3260_v7 }
 0x178   :  { %2810 = vmatpush3.bf16.msra.mxu0 %v3261_v8 }
 0x179   :  { %2811 = vmatprep.subr.bf16.mxu0 %v3262_v9 }
 0x17c   :  { %2812 = vmatpush3.bf16.msra.mxu0 %v3263_v10 }
 0x18f   :  { %v1518_v19 = vpop.f32.mrf.mxu0 }
 0x190   :  { %v1519_v35 = vadd.f32 %v1518_v19, %v1476_v30 }
 0x191   :  { %v1520_v21 = vpop.f32.mrf.mxu0 }
 0x192   :  { %v1521_v34 = vadd.f32 %v1520_v21, %v1478_v29 }
 0x193   :  { %v1522_v25 = vpop.f32.mrf.mxu0 }
 0x194   :  { %v1523_v39 = vadd.f32 %v1522_v25, %v1480_v33 }
 0x195   :  { %v1524_v28 = vpop.f32.mrf.mxu0 }
 0x196   :  { %v1525_v46 = vadd.f32 %v1524_v28, %v1482_v15 }
 0x197   :  { %v1561_v31 = vpop.f32.mrf.mxu1  ;;  %v1604_v32 = vpop.f32.mrf.mxu0 }
 0x198   :  { %v1562_v42 = vadd.f32 %v1561_v31, %v1519_v35 }
 0x199   :  { %v1563_v36 = vpop.f32.mrf.mxu1  ;;  %v1606_v38 = vpop.f32.mrf.mxu0 }
 0x19a   :  { %v1564_v40 = vadd.f32 %v1563_v36, %v1521_v34  ;;  %v1605_v50 = vadd.f32 %v1604_v32, %v1562_v42 }
 0x19b   :  { %v1565_v43 = vpop.f32.mrf.mxu1  ;;  %v1608_v44 = vpop.f32.mrf.mxu0 }
 0x19c   :  { %v1566_v41 = vadd.f32 %v1565_v43, %v1523_v39  ;;  %v1607_v48 = vadd.f32 %v1606_v38, %v1564_v40  ;;  %v1615_v54 = vmax.f32 %v1605_v50, 0.0 }
 0x19d   :  { %v1567_v55 = vpop.f32.mrf.mxu1  ;;  %v1610_v47 = vpop.f32.mrf.mxu0 }
 0x19e   :  { %v1609_v14 = vadd.f32 %v1608_v44, %v1566_v41  ;;  %v1568_v49 = vadd.f32 %v1567_v55, %v1525_v46  ;;  %v1616_v53 = vmax.f32 %v1607_v48, 0.0  ;;  %v3269_v46 = vld [vmem:[%s3769_s5 + $0x10] sm:$0xff]   ;;  %v3270_v41 = vld [vmem:[%s3769_s5 + $0x8] sm:$0xff]   ;;  %v3271_v55 = vld [vmem:[%s3769_s5] sm:$0xff]  }
 0x19f   :  { %v3735_v48 = vld [vmem:[%s3765_s1 + $0x8] sm:$0xff] }
 0x1a0   :  { %v1611_v51 = vadd.f32 %v1610_v47, %v1568_v49  ;;  %v1619_v52 = vmax.f32 %v1609_v14, 0.0  ;;  %v3729_v47 = vld [vmem:[%s3765_s1] sm:$0xff]  ;;  %vm2457_vm6 = vcmp.ge.s32.totalorder %v3735_v48, 0 }
 0x1a1   :  { %2439 = vperm.xlu1 %2856, %v3729_v47   ;;  %vm2456_vm5 = vcmp.ge.s32.totalorder %v3729_v47, 0 }
 0x1a2   :  { %v1620_v45 = vmax.f32 %v1611_v51, 0.0  ;;  %v1623_v57 = vpack.c.bf16 %v1619_v52, %v1615_v54  ;;  %v2758_v51 = vld [vmem:[%s3770_s6 + $0x6] ss:$0 sm:$0xff] }
 0x1a4   :  { %v1624_v56 = vpack.c.bf16 %v1620_v45, %v1616_v53 }
 0x1a5   :  { %2442 = vperm.xlu1 %2856, %v3735_v48  }
 0x1a6   :  { %2095 = vmatprep.mubr.bf16.mxu1 %v1624_v56 }
 0x1a7   :  { %2096 = vmatmul.mubr.bf16.vlgmr.msra.gmra.mxu1 %v1623_v57 }
 0x1a8   :  { %2829 = vmatpush3.bf16.msra.mxu1 %v3264_v11  ;;  %2844 = vmatprep.mubr.msk.bf16.mxu1 %vm3307_vm1, %v3306_v12 }
 0x1a9   :  { %2830 = vmatprep.subr.bf16.mxu1 %v3306_v12 }
 0x1ac   :  { %2831 = vmatpush3.bf16.msra.mxu1 %v3265_v13 }
 0x1ad   :  { %2832 = vmatprep.subr.bf16.mxu1 %v3306_v12 }
 0x1b0   :  { %2833 = vmatpush3.bf16.msra.mxu1 %v3266_v16 }
 0x1b1   :  { %2834 = vmatprep.subr.bf16.mxu1 %v3306_v12 }
 0x1b4   :  { %2835 = vmatpush3.bf16.msra.mxu1 %v3267_v17 }
 0x1b5   :  { %2836 = vmatprep.subr.bf16.mxu1 %v3306_v12 }
 0x1b8   :  { %2837 = vmatpush3.bf16.msra.mxu1 %v3268_v27 }
 0x1b9   :  { %2838 = vmatprep.subr.bf16.mxu1 %v3306_v12 }
 0x1bc   :  { %2839 = vmatpush3.bf16.msra.mxu1 %v3269_v46 }
 0x1bd   :  { %2840 = vmatprep.subr.bf16.mxu1 %v3306_v12 }
 0x1c0   :  { %2841 = vmatpush3.bf16.msra.mxu1 %v3270_v41 }
 0x1c1   :  { %2842 = vmatprep.subr.bf16.mxu1 %v3306_v12 }
 0x1c4   :  { %2843 = vmatpush3.bf16.msra.mxu1 %v3271_v55 }
 0x21c   :  { %v2440_v16 = vpop.permute.xlu1 %2439 }
 0x21d   :  { %vm2444_vm3 = vcmp.eq.s32.totalorder %v3742_v60, %v2440_v16 }
 0x21f   :  { %v2054_v18 = vpop.f32.mrf.mxu0 }
 0x220   :  { %v2055_v31 = vadd.f32 %v2054_v18, %v1693_v23  ;;  %v2443_v17 = vpop.permute.xlu1 %2442 }
 0x221   :  { %v2056_v19 = vpop.f32.mrf.mxu0  ;;  %vm2445_vm4 = vcmp.eq.s32.totalorder %v3742_v60, %v2443_v17 }
 0x222   :  { %v2057_v29 = vadd.f32 %v2056_v19, %v1697_v22  ;;  %v2786_v19 = vsel %vm2444_vm3, 1.0, %v3306_v12 }
 0x223   :  { %v2058_v21 = vpop.f32.mrf.mxu0 }
 0x224   :  { %v2059_v30 = vadd.f32 %v2058_v21, %v1693_v23 }
 0x225   :  { %v2060_v26 = vpop.f32.mrf.mxu0 }
 0x226   :  { %v2061_v33 = vadd.f32 %v2060_v26, %v1697_v22  ;;  %v2787_v22 = vsel %vm2445_vm4, 1.0, %v3306_v12 }
 0x267   :  { %v2097_v25 = vpop.f32.mrf.mxu1 }
 0x268   :  { %v2098_v36 = vadd.f32 %v2097_v25, %v2055_v31 }
 0x269   :  { %v2099_v28 = vpop.f32.mrf.mxu1 }
 0x26a   :  { %v2100_v34 = vadd.f32 %v2099_v28, %v2057_v29  ;;  %v2106_v24 = vmax.f32 %v2098_v36, 0.0 }
 0x26b   :  { %v2101_v32 = vpop.f32.mrf.mxu1 }
 0x26c   :  { %v2102_v35 = vadd.f32 %v2101_v32, %v2059_v30  ;;  %v2107_v40 = vmax.f32 %v2100_v34, 0.0 }
 0x26d   :  { %v2103_v38 = vpop.f32.mrf.mxu1 }
 0x26e   :  { %v2104_v15 = vadd.f32 %v2103_v38, %v2061_v33  ;;  %v2108_v39 = vmax.f32 %v2102_v35, 0.0  ;;  %v2788_v35 = vsel %vm2456_vm5, 1.0, %v3306_v12  ;;  %v2789_v38 = vsel %vm2457_vm6, 1.0, %v3306_v12 }
 0x270   :  { %v2109_v42 = vmax.f32 %v2104_v15, 0.0  ;;  %v2110_v44 = vpack.c.bf16 %v2108_v39, %v2106_v24 }
 0x272   :  { %v2111_v43 = vpack.c.bf16 %v2109_v42, %v2107_v40 }
 0x274   :  { %2278 = vmatprep.mubr.bf16.mxu0 %v2111_v43 }
 0x275   :  { %2279 = vmatmul.mubr.bf16.vlgmr.msra.gmra.mxu0 %v2110_v44 }
 0x335   :  { %v2813_v14 = vpop.f32.mrf.mxu0 }
 0x337   :  { %v2814_v49 = vpop.f32.mrf.mxu0 }
 0x338   :  { %v2815_v50 = vadd.f32 %v2814_v49, %v2813_v14 }
 0x339   :  { %v2816_v52 = vpop.f32.mrf.mxu0 }
 0x33a   :  { %v2281_v45 = vadd.f32 %v2815_v50, %v2758_v51 }
 0x33b   :  { %v2817_v53 = vpop.f32.mrf.mxu0 }
 0x33c   :  { %v2818_v54 = vadd.f32 %v2817_v53, %v2816_v52  ;;  %v2287_v57 = vmax.f32 %v2281_v45, 0.0 }
 0x33e   :  { %v2284_v56 = vadd.f32 %v2818_v54, %v2758_v51 }
 0x340   :  { %v2288_v58 = vmax.f32 %v2284_v56, 0.0 }
 0x342   :  { %v2289_v59 = vpack.c.bf16 %v2288_v58, %v2287_v57 }
 0x344   :  { %2845 = vmatmul.mubr.bf16.vlgmr.msra.gmra.mxu1 %v2289_v59 }
 0x404   :  { %v2394_v62 = vpop.f32.mrf.mxu1 }
 0x405   :  { %v2395_v63 = vadd.f32 %v2775_v61, %v2394_v62 }
 0x406   :  { %v2846_v1 = vpop.f32.mrf.mxu1 }
 0x407   :  { %v2414_v2 = vsel %vm2413_vm2, %v2395_v63, -1e+30 }
 0x408   :  { %2416 = vmax.xlane.f32.xlu0 %v2414_v2  ;;  %v2397_v3 = vpop.f32.mrf.mxu1  ;;  %v2450_v20 = vmul.f32 %v2786_v19, %v2414_v2 }
 0x409   :  { %v2398_v4 = vadd.f32 %v2775_v61, %v2397_v3 }
 0x40a   :  { %v2847_v5 = vpop.f32.mrf.mxu1 }
 0x40b   :  { %v2795_v6 = vpack.c.bf16 %v2398_v4, %v2395_v63  ;;  %v2415_v7 = vsel %vm2413_vm2, %v2398_v4, -1e+30 }
 0x40c   :  { %2418 = vmax.xlane.f32.xlu0 %v2415_v7  ;;  %v2451_v23 = vmul.f32 %v2787_v22, %v2415_v7 }
 0x40d   :  { %2796 = vst [vmem:[%s3771_s7] sm:$0xff] %v2795_v6  }
 0x491   :  { %v2417_v37 = vpop.xlane.xlu0 %2416 }
 0x492   :  { %v2420_v8 = vsub.f32 %v2414_v2, %v2417_v37 }
 0x494   :  { %v2422_v9 = vmul.f32 1.442695, %v2420_v8 }
 0x495   :  { %v2419_v10 = vpop.xlane.xlu0 %2418 }
 0x496   :  { %3272 = vpow2.f32 %v2422_v9  ;;  %v2421_v11 = vsub.f32 %v2415_v7, %v2419_v10 }
 0x498   :  { %v2424_v13 = vmul.f32 1.442695, %v2421_v11 }
 0x49a   :  { %3274 = vpow2.f32 %v2424_v13 }
 0x4a3   :  { %v3273_v18 = vpop.eup %3272 }
 0x4a4   :  { %2426 = vadd.xlane.f32.xlu0 %v3273_v18 }
 0x4a7   :  { %v3275_v21 = vpop.eup %3274 }
 0x4a8   :  { %2452 = vadd.xlane.f32.xlu0 %v2450_v20  ;;  %2428 = vadd.xlane.f32.xlu1 %v3275_v21 }
 0x4ac   :  { %2454 = vadd.xlane.f32.xlu0 %v2451_v23 }
 0x52d   :  { %v2427_v25 = vpop.xlane.xlu0 %2426 }
 0x52e   :  { %3276 = vlog2.f32 %v2427_v25 }
 0x531   :  { %v2429_v26 = vpop.xlane.xlu1 %2428  ;;  %v2453_v30 = vpop.xlane.xlu0 %2452 }
 0x532   :  { %3278 = vlog2.f32 %v2429_v26 }
 0x535   :  { %v2455_v15 = vpop.xlane.xlu0 %2454 }
 0x53b   :  { %v3277_v28 = vpop.eup %3276 }
 0x53c   :  { %v2431_v29 = vmul.f32 0.6931472, %v3277_v28 }
 0x53e   :  { %v2434_v31 = vadd.f32 %v2431_v29, %v2417_v37 }
 0x53f   :  { %v3279_v32 = vpop.eup %3278 }
 0x540   :  { %v2433_v33 = vmul.f32 0.6931472, %v3279_v32  ;;  %v2462_v34 = vsub.f32 %v2434_v31, %v2453_v30 }
 0x542   :  { %v2435_v36 = vadd.f32 %v2433_v33, %v2419_v10  ;;  %v2464_v39 = vmul.f32 %v2788_v35, %v2462_v34 }
 0x544   :  { %v2463_v40 = vsub.f32 %v2435_v36, %v2455_v15  ;;  %v2467_v24 = vsel %vm2466_vm7, %v2464_v39, 0.0 }
 0x546   :  { %v2465_v42 = vmul.f32 %v2789_v38, %v2463_v40 }
 0x548   :  { %v2468_v43 = vsel %vm2466_vm7, %v2465_v42, 0.0 }
 0x549   :  { %v2469_v44 = vadd.f32 %v2468_v43, %v2467_v24 }
 0x54b   :  { %2470 = vadd.xlane.f32.xlu0 %v2469_v44 }
 0x5d4   :  { %v2471_v27 = vpop.xlane.xlu0 %2470 }
 0x5d5   :  { %v2472_v46 = vrot.slane %v2471_v27, 4 }
 0x5d7   :  { %v2473_v41 = vadd.f32 %v2472_v46, %v2471_v27 }
 0x5d9   :  { %v2474_v55 = vrot.slane %v2473_v41, 2 }
 0x5db   :  { %v2475_v47 = vadd.f32 %v2474_v55, %v2473_v41 }
 0x5dd   :  { %v2476_v48 = vrot.slane %v2475_v47, 1 }
 0x5df   :  { %v2477_v14 = vadd.f32 %v2476_v48, %v2475_v47 }
 0x5e1   :  { %2848 = vpush %v2477_v14 }
 0x612   :  { %s2849_s6 = spop %2848 }
 0x613   :  { %v2484_v12 = vstv %s2849_s6 }
 0x614   :  { %v2485_v49 = vsel %vm2483_vm10, %v2484_v12, 0.0 }
 0x615   :  { %2486 = vst [vmem:[%s3772_s8] sm:$0xff] %v2485_v49 }
 0x616   :  { %2495 = vsyncpa [#allocation3], 1 }

</bundles_post_ra>
